<compile_context>
chip_gen: v7x
topology: tpu7x:2x2x1
jax: 0.10.0
libtpu: 0.0.40
codegen_flags: <defaults>
</compile_context>

<pallas_src>
import functools
import math

import jax
import jax.numpy as jnp
from jax.experimental import pallas as pl
from jax.experimental.pallas import tpu as pltpu


def _round_up(n, m):
    return pl.cdiv(n, m) * m


def _gate_kernel(x_ref, w1t_ref, b1_ref, w2t_ref, b2_ref, o_ref,
                 *, num_experts, intermediate_dim):
    """One grid step = one token tile, all experts.

    x_ref   : (TM, H)      bf16  token tile
    w1t_ref : (H, E*I)     bf16  all experts' W1^T packed side-by-side
    b1_ref  : (1, E*I)     f32
    w2t_ref : (E, I, H)    bf16  per-expert W2^T
    b2_ref  : (E, H)       f32
    o_ref   : (E, TM)      f32   -mean((x - recon)^2, axis=-1), tokens on lanes
    """
    E = num_experts
    idim = intermediate_dim

    x = x_ref[...]                      # (TM, H) bf16
    xf = x.astype(jnp.float32)          # f32 copy for residual / loss math
    inv_h = jnp.float32(1.0 / x.shape[-1])

    # Encoder for all experts fused into one wide MXU matmul: (TM, E*I).
    h = jnp.dot(x, w1t_ref[...], preferred_element_type=jnp.float32)
    h = jnp.maximum(h + b1_ref[...], 0.0)       # bias add + ReLU in f32
    hb = h.astype(jnp.bfloat16)                 # bf16 operand for the decoder

    for e in range(E):                          # small expert loop, unrolled
        he = hb[:, e * idim:(e + 1) * idim]     # (TM, I) bf16
        recon = jnp.dot(he, w2t_ref[e], preferred_element_type=jnp.float32)
        # Fuse decoder bias into the residual: d = (x - b2_e) - h_e @ W2_e^T
        d = (xf - b2_ref[e]) - recon            # (TM, H) f32
        loss = jnp.sum(d * d, axis=-1) * inv_h  # (TM,) f32, per-token MSE
        o_ref[e, :] = -loss                     # lane-major row write


def prepare_gate_params(w1, b1, w2, b2, compute_dtype=jnp.bfloat16):
    """One-time packing of PyTorch-layout expert weights (do at setup time).

    w1: (E, I, H), b1: (E, I), w2: (E, H, I), b2: (E, H)
    """
    E, idim, H = w1.shape
    # (E, I, H) -> (H, E, I) -> (H, E*I): column block e is W1[e].T
    w1t_all = jnp.transpose(w1, (2, 0, 1)).reshape(H, E * idim).astype(compute_dtype)
    b1_all = b1.reshape(1, E * idim).astype(jnp.float32)
    w2t = jnp.transpose(w2, (0, 2, 1)).astype(compute_dtype)   # (E, I, H)
    b2f = b2.astype(jnp.float32)                               # (E, H)
    return w1t_all, b1_all, w2t, b2f


def auto_encoders_gate(hidden_states, params, *, tm_target=512):
    """hidden_states: (B, S, H); params from prepare_gate_params.
    Returns routing_logits: (B, S, E)."""
    B, S, H = hidden_states.shape
    w1t_all, b1_all, w2t, b2 = params
    E, idim, _ = w2t.shape
    N = B * S

    # Token tile: multiple of 128 (lane-dense output), capped for VMEM headroom
    # across v5e/v6e/v7x.
    TM = min(tm_target, _round_up(N, 128))
    N_pad = _round_up(N, TM)

    x = hidden_states.reshape(N, H).astype(jnp.bfloat16)
    if N_pad != N:
        x = jnp.pad(x, ((0, N_pad - N), (0, 0)))

    kernel = functools.partial(_gate_kernel, num_experts=E, intermediate_dim=idim)

    out = pl.pallas_call(
        kernel,
        out_shape=jax.ShapeDtypeStruct((E, N_pad), jnp.float32),
        grid_spec=pltpu.PrefetchScalarGridSpec(
            num_scalar_prefetch=0,
            grid=(N_pad // TM,),
            in_specs=[
                pl.BlockSpec((TM, H), lambda t: (t, 0)),         # streamed tokens
                pl.BlockSpec((H, E * idim), lambda t: (0, 0)),   # packed W1^T (resident)
                pl.BlockSpec((1, E * idim), lambda t: (0, 0)),   # b1 (resident)
                pl.BlockSpec((E, idim, H), lambda t: (0, 0, 0)), # W2^T (resident)
                pl.BlockSpec((E, H), lambda t: (0, 0)),          # b2 (resident)
            ],
            out_specs=pl.BlockSpec((E, TM), lambda t: (0, t)),   # lane-dense logits
        ),
        compiler_params=pltpu.CompilerParams(
            dimension_semantics=("parallel",),        # token-parallel (megacore)
            vmem_limit_bytes=32 * 1024 * 1024,
        ),
    )(x, w1t_all, b1_all, w2t, b2)

    # (E, N) -> (N, E) -> (B, S, E)  (matches torch: stack -> transpose -> reshape)
    logits = out[:, :N].T.reshape(B, S, E)
    return logits.astype(hidden_states.dtype)


# ----------------------------- references ---------------------------------


def _reference_f32(hidden_states, w1, b1, w2, b2):
    """Pure-f32 JAX reference replicating the PyTorch forward."""
    B, S, H = hidden_states.shape
    x = hidden_states.reshape(-1, H).astype(jnp.float32)
    losses = []
    for e in range(w1.shape[0]):
        h = jnp.maximum(x @ w1[e].T + b1[e], 0.0)
        y = h @ w2[e].T + b2[e]
        losses.append(jnp.mean((x - y) ** 2, axis=-1))
    loss = jnp.stack(losses)              # (E, N)
    return (-loss.T).reshape(B, S, w1.shape[0])


def _reference_bf16(hidden_states, w1, b1, w2, b2):
    """Reference with the kernel's dtype discipline (bf16 operands, f32 accum)."""
    B, S, H = hidden_states.shape
    xb = hidden_states.reshape(-1, H).astype(jnp.bfloat16)
    xf = xb.astype(jnp.float32)
    losses = []
    for e in range(w1.shape[0]):
        w1b = w1[e].T.astype(jnp.bfloat16)
        w2b = w2[e].T.astype(jnp.bfloat16)
        h = jnp.dot(xb, w1b, preferred_element_type=jnp.float32) + b1[e]
        h = jnp.maximum(h, 0.0).astype(jnp.bfloat16)
        y = jnp.dot(h, w2b, preferred_element_type=jnp.float32) + b2[e]
        losses.append(jnp.mean((xf - y) ** 2, axis=-1))
    loss = jnp.stack(losses)
    return (-loss.T).reshape(B, S, w1.shape[0])


def _init_linear(key, out_f, in_f):
    """PyTorch-Linear-style init: U(-1/sqrt(fan_in), 1/sqrt(fan_in))."""
    kw, kb = jax.random.split(key)
    bound = 1.0 / math.sqrt(in_f)
    w = jax.random.uniform(kw, (out_f, in_f), jnp.float32, -bound, bound)
    b = jax.random.uniform(kb, (out_f,), jnp.float32, -bound, bound)
    return w, b


if __name__ == "__main__":
    # Small shapes consistent with the module.
    B, S, H = 2, 8, 32          # batch, seq, in_features
    E, IDIM = 4, 128            # num_experts, intermediate_dim (module default)

    key = jax.random.PRNGKey(0)
    k_x, k_x2, *k_experts = jax.random.split(key, 2 + E)

    hidden_states = jax.random.normal(k_x, (B, S, H), jnp.float32)

    w1_list, b1_list, w2_list, b2_list = [], [], [], []
    for ke in k_experts:
        k1, k2 = jax.random.split(ke)
        w1e, b1e = _init_linear(k1, IDIM, H)   # Linear(in_features, intermediate_dim)
        w2e, b2e = _init_linear(k2, H, IDIM)   # Linear(intermediate_dim, in_features)
        w1_list.append(w1e); b1_list.append(b1e)
        w2_list.append(w2e); b2_list.append(b2e)

    w1 = jnp.stack(w1_list)   # (E, I, H)
    b1 = jnp.stack(b1_list)   # (E, I)
    w2 = jnp.stack(w2_list)   # (E, H, I)
    b2 = jnp.stack(b2_list)   # (E, H)

    # One-time parameter packing (setup-time, not per forward).
    params = prepare_gate_params(w1, b1, w2, b2)
    gate = jax.jit(auto_encoders_gate)

    # --- small single-tile case ---
    logits = jax.block_until_ready(gate(hidden_states, params))
    assert logits.shape == (B, S, E), logits.shape
    ref_bf16 = _reference_bf16(hidden_states, w1, b1, w2, b2)
    ref_f32 = _reference_f32(hidden_states, w1, b1, w2, b2)
    assert jnp.allclose(logits, ref_bf16, atol=1e-3, rtol=1e-3), "mismatch vs bf16-matched reference"
    assert jnp.allclose(logits, ref_f32, atol=5e-2, rtol=5e-2), "mismatch vs f32 reference"

    # --- larger multi-tile case (exercises token tiling / padding) ---
    B2, S2 = 4, 512             # N = 2048 -> 4 token tiles of 512
    hidden_states2 = jax.random.normal(k_x2, (B2, S2, H), jnp.float32)
    logits2 = jax.block_until_ready(gate(hidden_states2, params))
    assert logits2.shape == (B2, S2, E), logits2.shape
    ref2_bf16 = _reference_bf16(hidden_states2, w1, b1, w2, b2)
    assert jnp.allclose(logits2, ref2_bf16, atol=1e-3, rtol=1e-3), "multi-tile mismatch"

    print("KERNEL_OK")
</pallas_src>

<mosaic_0001>
module attributes {stable_mosaic.version = 11 : i64} {
  func.func @_gate_kernel(%arg0: i32, %arg1: memref<128x32xbf16, #tpu.memory_space<vmem>>, %arg2: memref<32x512xbf16, #tpu.memory_space<vmem>>, %arg3: memref<1x512xf32, #tpu.memory_space<vmem>>, %arg4: memref<4x128x32xbf16, #tpu.memory_space<vmem>>, %arg5: memref<4x32xf32, #tpu.memory_space<vmem>>, %arg6: memref<4x128xf32, #tpu.memory_space<vmem>>) attributes {dimension_semantics = [#tpu.dimension_semantics<parallel>], iteration_bounds = array<i64: 1>, scalar_prefetch = 0 : i64, scratch_operands = 0 : i64, tpu.core_type = #tpu.core_type<tc>, window_params = [{transform_indices = @transform_0, window_bounds = array<i64: 128, 32>}, {pipeline_mode = #tpu.pipeline_mode<synchronous>, transform_indices = @transform_1, window_bounds = array<i64: 32, 512>}, {pipeline_mode = #tpu.pipeline_mode<synchronous>, transform_indices = @transform_2, window_bounds = array<i64: 1, 512>}, {pipeline_mode = #tpu.pipeline_mode<synchronous>, transform_indices = @transform_3, window_bounds = array<i64: 4, 128, 32>}, {pipeline_mode = #tpu.pipeline_mode<synchronous>, transform_indices = @transform_4, window_bounds = array<i64: 4, 32>}, {transform_indices = @transform_5, window_bounds = array<i64: 4, 128>}]} {
    %c0 = arith.constant 0 : index
    %c0_0 = arith.constant 0 : index
    %0 = vector.load %arg1[%c0, %c0_0] : memref<128x32xbf16, #tpu.memory_space<vmem>>, vector<128x32xbf16>
    %1 = arith.extf %0 : vector<128x32xbf16> to vector<128x32xf32>
    %c0_1 = arith.constant 0 : index
    %c0_2 = arith.constant 0 : index
    %2 = vector.load %arg2[%c0_1, %c0_2] : memref<32x512xbf16, #tpu.memory_space<vmem>>, vector<32x512xbf16>
    %cst = arith.constant dense<0.000000e+00> : vector<128x512xf32>
    %3 = tpu.matmul %0, %2, %cst {dimension_numbers = #tpu.dot_dimension_numbers<[1], [0], [0], [1], [0, 0, 1, 1], [], []>} : vector<128x32xbf16>, vector<32x512xbf16>, vector<128x512xf32> -> vector<128x512xf32>
    %c0_3 = arith.constant 0 : index
    %c0_4 = arith.constant 0 : index
    %4 = vector.load %arg3[%c0_3, %c0_4] : memref<1x512xf32, #tpu.memory_space<vmem>>, vector<1x512xf32>
    %5 = vector.broadcast %4 : vector<1x512xf32> to vector<128x512xf32>
    %6 = arith.addf %3, %5 : vector<128x512xf32>
    %cst_5 = arith.constant 0.000000e+00 : f32
    %7 = vector.broadcast %cst_5 : f32 to vector<128x512xf32>
    %8 = arith.maximumf %6, %7 : vector<128x512xf32>
    %9 = arith.truncf %8 : vector<128x512xf32> to vector<128x512xbf16>
    %10 = vector.extract_strided_slice %9 {offsets = [0, 0], sizes = [128, 128], strides = [1, 1]} : vector<128x512xbf16> to vector<128x128xbf16>
    %c0_6 = arith.constant 0 : index
    %c0_7 = arith.constant 0 : index
    %c0_8 = arith.constant 0 : index
    %11 = vector.load %arg4[%c0_6, %c0_7, %c0_8] : memref<4x128x32xbf16, #tpu.memory_space<vmem>>, vector<1x128x32xbf16>
    %12 = vector.shape_cast %11 : vector<1x128x32xbf16> to vector<128x32xbf16>
    %cst_9 = arith.constant dense<0.000000e+00> : vector<128x32xf32>
    %13 = tpu.matmul %10, %12, %cst_9 {dimension_numbers = #tpu.dot_dimension_numbers<[1], [0], [0], [1], [0, 0, 1, 1], [], []>} : vector<128x128xbf16>, vector<128x32xbf16>, vector<128x32xf32> -> vector<128x32xf32>
    %c0_10 = arith.constant 0 : index
    %c0_11 = arith.constant 0 : index
    %14 = vector.load %arg5[%c0_10, %c0_11] : memref<4x32xf32, #tpu.memory_space<vmem>>, vector<1x32xf32>
    %15 = vector.shape_cast %14 : vector<1x32xf32> to vector<32xf32>
    %16 = vector.shape_cast %15 : vector<32xf32> to vector<1x32xf32>
    %17 = vector.broadcast %16 : vector<1x32xf32> to vector<128x32xf32>
    %18 = arith.subf %1, %17 : vector<128x32xf32>
    %19 = arith.subf %18, %13 : vector<128x32xf32>
    %20 = arith.mulf %19, %19 : vector<128x32xf32>
    %cst_12 = arith.constant dense<0.000000e+00> : vector<128xf32>
    %21 = vector.multi_reduction <add>, %20, %cst_12 [1] : vector<128x32xf32> to vector<128xf32>
    %cst_13 = arith.constant 3.125000e-02 : f32
    %22 = vector.broadcast %cst_13 : f32 to vector<128xf32>
    %23 = arith.mulf %21, %22 : vector<128xf32>
    %cst_14 = arith.constant 0.000000e+00 : f32
    %24 = vector.broadcast %cst_14 : f32 to vector<128xf32>
    %25 = arith.subf %24, %23 : vector<128xf32>
    %c0_15 = arith.constant 0 : index
    %c0_16 = arith.constant 0 : index
    %26 = vector.load %arg6[%c0_15, %c0_16] : memref<4x128xf32, #tpu.memory_space<vmem>>, vector<1x128xf32>
    %27 = vector.shape_cast %26 : vector<1x128xf32> to vector<128xf32>
    %28 = vector.shape_cast %25 : vector<128xf32> to vector<1x128xf32>
    tpu.vector_store %arg6[%c0_15, %c0_16], %28 {strides = array<i32>} : memref<4x128xf32, #tpu.memory_space<vmem>>, vector<1x128xf32>,
    %29 = vector.extract_strided_slice %9 {offsets = [0, 128], sizes = [128, 128], strides = [1, 1]} : vector<128x512xbf16> to vector<128x128xbf16>
    %c1 = arith.constant 1 : index
    %c0_17 = arith.constant 0 : index
    %c0_18 = arith.constant 0 : index
    %30 = vector.load %arg4[%c1, %c0_17, %c0_18] : memref<4x128x32xbf16, #tpu.memory_space<vmem>>, vector<1x128x32xbf16>
    %31 = vector.shape_cast %30 : vector<1x128x32xbf16> to vector<128x32xbf16>
    %cst_19 = arith.constant dense<0.000000e+00> : vector<128x32xf32>
    %32 = tpu.matmul %29, %31, %cst_19 {dimension_numbers = #tpu.dot_dimension_numbers<[1], [0], [0], [1], [0, 0, 1, 1], [], []>} : vector<128x128xbf16>, vector<128x32xbf16>, vector<128x32xf32> -> vector<128x32xf32>
    %c1_20 = arith.constant 1 : index
    %c0_21 = arith.constant 0 : index
    %33 = vector.load %arg5[%c1_20, %c0_21] : memref<4x32xf32, #tpu.memory_space<vmem>>, vector<1x32xf32>
    %34 = vector.shape_cast %33 : vector<1x32xf32> to vector<32xf32>
    %35 = vector.shape_cast %34 : vector<32xf32> to vector<1x32xf32>
    %36 = vector.broadcast %35 : vector<1x32xf32> to vector<128x32xf32>
    %37 = arith.subf %1, %36 : vector<128x32xf32>
    %38 = arith.subf %37, %32 : vector<128x32xf32>
    %39 = arith.mulf %38, %38 : vector<128x32xf32>
    %cst_22 = arith.constant dense<0.000000e+00> : vector<128xf32>
    %40 = vector.multi_reduction <add>, %39, %cst_22 [1] : vector<128x32xf32> to vector<128xf32>
    %cst_23 = arith.constant 3.125000e-02 : f32
    %41 = vector.broadcast %cst_23 : f32 to vector<128xf32>
    %42 = arith.mulf %40, %41 : vector<128xf32>
    %cst_24 = arith.constant 0.000000e+00 : f32
    %43 = vector.broadcast %cst_24 : f32 to vector<128xf32>
    %44 = arith.subf %43, %42 : vector<128xf32>
    %c1_25 = arith.constant 1 : index
    %c0_26 = arith.constant 0 : index
    %45 = vector.load %arg6[%c1_25, %c0_26] : memref<4x128xf32, #tpu.memory_space<vmem>>, vector<1x128xf32>
    %46 = vector.shape_cast %45 : vector<1x128xf32> to vector<128xf32>
    %47 = vector.shape_cast %44 : vector<128xf32> to vector<1x128xf32>
    tpu.vector_store %arg6[%c1_25, %c0_26], %47 {strides = array<i32>} : memref<4x128xf32, #tpu.memory_space<vmem>>, vector<1x128xf32>,
    %48 = vector.extract_strided_slice %9 {offsets = [0, 256], sizes = [128, 128], strides = [1, 1]} : vector<128x512xbf16> to vector<128x128xbf16>
    %c2 = arith.constant 2 : index
    %c0_27 = arith.constant 0 : index
    %c0_28 = arith.constant 0 : index
    %49 = vector.load %arg4[%c2, %c0_27, %c0_28] : memref<4x128x32xbf16, #tpu.memory_space<vmem>>, vector<1x128x32xbf16>
    %50 = vector.shape_cast %49 : vector<1x128x32xbf16> to vector<128x32xbf16>
    %cst_29 = arith.constant dense<0.000000e+00> : vector<128x32xf32>
    %51 = tpu.matmul %48, %50, %cst_29 {dimension_numbers = #tpu.dot_dimension_numbers<[1], [0], [0], [1], [0, 0, 1, 1], [], []>} : vector<128x128xbf16>, vector<128x32xbf16>, vector<128x32xf32> -> vector<128x32xf32>
    %c2_30 = arith.constant 2 : index
    %c0_31 = arith.constant 0 : index
    %52 = vector.load %arg5[%c2_30, %c0_31] : memref<4x32xf32, #tpu.memory_space<vmem>>, vector<1x32xf32>
    %53 = vector.shape_cast %52 : vector<1x32xf32> to vector<32xf32>
    %54 = vector.shape_cast %53 : vector<32xf32> to vector<1x32xf32>
    %55 = vector.broadcast %54 : vector<1x32xf32> to vector<128x32xf32>
    %56 = arith.subf %1, %55 : vector<128x32xf32>
    %57 = arith.subf %56, %51 : vector<128x32xf32>
    %58 = arith.mulf %57, %57 : vector<128x32xf32>
    %cst_32 = arith.constant dense<0.000000e+00> : vector<128xf32>
    %59 = vector.multi_reduction <add>, %58, %cst_32 [1] : vector<128x32xf32> to vector<128xf32>
    %cst_33 = arith.constant 3.125000e-02 : f32
    %60 = vector.broadcast %cst_33 : f32 to vector<128xf32>
    %61 = arith.mulf %59, %60 : vector<128xf32>
    %cst_34 = arith.constant 0.000000e+00 : f32
    %62 = vector.broadcast %cst_34 : f32 to vector<128xf32>
    %63 = arith.subf %62, %61 : vector<128xf32>
    %c2_35 = arith.constant 2 : index
    %c0_36 = arith.constant 0 : index
    %64 = vector.load %arg6[%c2_35, %c0_36] : memref<4x128xf32, #tpu.memory_space<vmem>>, vector<1x128xf32>
    %65 = vector.shape_cast %64 : vector<1x128xf32> to vector<128xf32>
    %66 = vector.shape_cast %63 : vector<128xf32> to vector<1x128xf32>
    tpu.vector_store %arg6[%c2_35, %c0_36], %66 {strides = array<i32>} : memref<4x128xf32, #tpu.memory_space<vmem>>, vector<1x128xf32>,
    %67 = vector.extract_strided_slice %9 {offsets = [0, 384], sizes = [128, 128], strides = [1, 1]} : vector<128x512xbf16> to vector<128x128xbf16>
    %c3 = arith.constant 3 : index
    %c0_37 = arith.constant 0 : index
    %c0_38 = arith.constant 0 : index
    %68 = vector.load %arg4[%c3, %c0_37, %c0_38] : memref<4x128x32xbf16, #tpu.memory_space<vmem>>, vector<1x128x32xbf16>
    %69 = vector.shape_cast %68 : vector<1x128x32xbf16> to vector<128x32xbf16>
    %cst_39 = arith.constant dense<0.000000e+00> : vector<128x32xf32>
    %70 = tpu.matmul %67, %69, %cst_39 {dimension_numbers = #tpu.dot_dimension_numbers<[1], [0], [0], [1], [0, 0, 1, 1], [], []>} : vector<128x128xbf16>, vector<128x32xbf16>, vector<128x32xf32> -> vector<128x32xf32>
    %c3_40 = arith.constant 3 : index
    %c0_41 = arith.constant 0 : index
    %71 = vector.load %arg5[%c3_40, %c0_41] : memref<4x32xf32, #tpu.memory_space<vmem>>, vector<1x32xf32>
    %72 = vector.shape_cast %71 : vector<1x32xf32> to vector<32xf32>
    %73 = vector.shape_cast %72 : vector<32xf32> to vector<1x32xf32>
    %74 = vector.broadcast %73 : vector<1x32xf32> to vector<128x32xf32>
    %75 = arith.subf %1, %74 : vector<128x32xf32>
    %76 = arith.subf %75, %70 : vector<128x32xf32>
    %77 = arith.mulf %76, %76 : vector<128x32xf32>
    %cst_42 = arith.constant dense<0.000000e+00> : vector<128xf32>
    %78 = vector.multi_reduction <add>, %77, %cst_42 [1] : vector<128x32xf32> to vector<128xf32>
    %cst_43 = arith.constant 3.125000e-02 : f32
    %79 = vector.broadcast %cst_43 : f32 to vector<128xf32>
    %80 = arith.mulf %78, %79 : vector<128xf32>
    %cst_44 = arith.constant 0.000000e+00 : f32
    %81 = vector.broadcast %cst_44 : f32 to vector<128xf32>
    %82 = arith.subf %81, %80 : vector<128xf32>
    %c3_45 = arith.constant 3 : index
    %c0_46 = arith.constant 0 : index
    %83 = vector.load %arg6[%c3_45, %c0_46] : memref<4x128xf32, #tpu.memory_space<vmem>>, vector<1x128xf32>
    %84 = vector.shape_cast %83 : vector<1x128xf32> to vector<128xf32>
    %85 = vector.shape_cast %82 : vector<128xf32> to vector<1x128xf32>
    tpu.vector_store %arg6[%c3_45, %c0_46], %85 {strides = array<i32>} : memref<4x128xf32, #tpu.memory_space<vmem>>, vector<1x128xf32>,
    return
  }
  func.func @transform_0(%arg0: i32) -> (i32, i32) {
    %c0_i32 = arith.constant 0 : i32
    %c0_i32_0 = arith.constant 0 : i32
    return %arg0, %c0_i32 : i32, i32
  }
  func.func @transform_1(%arg0: i32) -> (i32, i32) {
    %c0_i32 = arith.constant 0 : i32
    %c0_i32_0 = arith.constant 0 : i32
    %c0_i32_1 = arith.constant 0 : i32
    return %c0_i32, %c0_i32_0 : i32, i32
  }
  func.func @transform_2(%arg0: i32) -> (i32, i32) {
    %c0_i32 = arith.constant 0 : i32
    %c0_i32_0 = arith.constant 0 : i32
    %c0_i32_1 = arith.constant 0 : i32
    return %c0_i32, %c0_i32_0 : i32, i32
  }
  func.func @transform_3(%arg0: i32) -> (i32, i32, i32) {
    %c0_i32 = arith.constant 0 : i32
    %c0_i32_0 = arith.constant 0 : i32
    %c0_i32_1 = arith.constant 0 : i32
    %c0_i32_2 = arith.constant 0 : i32
    return %c0_i32, %c0_i32_0, %c0_i32_1 : i32, i32, i32
  }
  func.func @transform_4(%arg0: i32) -> (i32, i32) {
    %c0_i32 = arith.constant 0 : i32
    %c0_i32_0 = arith.constant 0 : i32
    %c0_i32_1 = arith.constant 0 : i32
    return %c0_i32, %c0_i32_0 : i32, i32
  }
  func.func @transform_5(%arg0: i32) -> (i32, i32) {
    %c0_i32 = arith.constant 0 : i32
    %c0_i32_0 = arith.constant 0 : i32
    return %c0_i32, %arg0 : i32, i32
  }
}

</mosaic_0001>

<bundles_post_ra>
// kernel: auto_encoders_gate.1
= control target key start
LH: loop header
LB: loop body
LE: loop exit
PB: predicated region body
PF: predicated region fallthrough
CT: control target
= control target key end

     0   :  { %v2482_v1 = vmov 0   ;;  %vm163_vm0 = vcmask 261120   ;;  %v3493_v35 = vlaneseq  ;;  %vm831_vm1 = vcmask 130112   ;;  %s3487_s1 = inlined_call_operand.vmem [shape: bf16[32,512], index: 1, kind: input, shape index: {}]   ;;  %s3488_s0 = inlined_call_operand.vmem [shape: bf16[128,32], index: 0, kind: input, shape index: {}]   ;;  %s3489_s3 = inlined_call_operand.vmem [shape: bf16[4,128,32], index: 3, kind: input, shape index: {}]   ;;  %s3490_s2 = inlined_call_operand.vmem [shape: f32[1,512], index: 2, kind: input, shape index: {}]   ;;  %s3491_s4 = inlined_call_operand.vmem [shape: f32[4,32], index: 4, kind: input, shape index: {}]   ;;  %s3492_s5 = inlined_call_operand.vmem [shape: f32[4,128], index: 5, kind: output, shape index: {}]  }
   0x1   :  { %v2422_v0 = vld [vmem:[%s3487_s1 + $0x4] ss:$16 sps:$4 sm:$0xff]   ;;  %220 = vmatprep.mubr.bf16.mxu0 %v2482_v1  ;;  %333 = vmatprep.mubr.bf16.mxu1 %v2482_v1  ;;  %v2424_v2 = vld [vmem:[%s3487_s1] ss:$16 sps:$4 sm:$0xff]   ;;  %v2435_v6 = vld [vmem:[%s3487_s1 + $0xc] ss:$16 sps:$4 sm:$0xff]  }
   0x2   :  { %188 = vmatprep.subr.bf16.mxu0 %v2422_v0  ;;  %v2425_v3 = vld [vmem:[%s3487_s1 + $0x24] ss:$16 sps:$4 sm:$0xff]   ;;  %v2427_v4 = vld [vmem:[%s3487_s1 + $0x20] ss:$16 sps:$4 sm:$0xff]   ;;  %v2437_v7 = vld [vmem:[%s3487_s1 + $0x8] ss:$16 sps:$4 sm:$0xff]   ;;  %301 = vmatprep.subr.bf16.mxu1 %v2435_v6 }
   0x3   :  { %189 = vmatpush1.bf16.msra.mxu0 %v2424_v2  ;;  %v2530_v5 = vld [vmem:[%s3488_s0] sm:$0xff]   ;;  %v2438_v8 = vld [vmem:[%s3487_s1 + $0x2c] ss:$16 sps:$4 sm:$0xff]   ;;  %v2441_v9 = vld [vmem:[%s3487_s1 + $0x28] ss:$16 sps:$4 sm:$0xff]   ;;  %302 = vmatpush1.bf16.msra.mxu1 %v2437_v7  ;;  %v2686_v36 = vshrl.u32 %v3493_v35, 7 }
   0x4   :  { %190 = vmatprep.subr.bf16.mxu0 %v2425_v3  ;;  %v2442_v10 = vld [vmem:[%s3489_s3] sm:$0xff]   ;;  %303 = vmatprep.subr.bf16.mxu1 %v2438_v8  ;;  %v2444_v12 = vld [vmem:[%s3489_s3 + $0x8] sm:$0xff]   ;;  %v2446_v15 = vld [vmem:[%s3489_s3 + $0x10] sm:$0xff]   ;;  %vm838_vm2 = vcmask 195712   ;;  %vm845_vm3 = vcmask 261312   ;;  %vm852_vm4 = vcmask 326912  }
   0x5   :  { %v2443_v11 = vld [vmem:[%s3489_s3 + $0x40] sm:$0xff]   ;;  %v2559_v13 = vld [vmem:[%s3488_s0 + $0x8] sm:$0xff]   ;;  %v2448_v16 = vld [vmem:[%s3489_s3 + $0x18] sm:$0xff]   ;;  %v65_v37 = vsub.s32 0, %v2686_v36  ;;  %v69_v39 = vsub.s32 1, %v2686_v36  ;;  %v73_v42 = vsub.s32 2, %v2686_v36 }
   0x6   :  { %v2445_v14 = vld [vmem:[%s3489_s3 + $0x48] sm:$0xff]   ;;  %v2447_v17 = vld [vmem:[%s3489_s3 + $0x50] sm:$0xff]   ;;  %v2449_v19 = vld [vmem:[%s3489_s3 + $0x58] sm:$0xff]   ;;  %v77_v43 = vsub.s32 3, %v2686_v36  ;;  %vm859_vm5 = vcmask 392512   ;;  %vm866_vm6 = vcmask 458112  }
   0x7   :  { %191 = vmatpush1.bf16.msra.mxu0 %v2427_v4  ;;  %304 = vmatpush1.bf16.msra.mxu1 %v2441_v9  ;;  %v2581_v18 = vld [vmem:[%s3488_s0 + $0x10] sm:$0xff]   ;;  %v2450_v20 = vld [vmem:[%s3489_s3 + $0x20] sm:$0xff]   ;;  %v2452_v21 = vld [vmem:[%s3489_s3 + $0x28] sm:$0xff]   ;;  %vm873_vm7 = vcmask 523712   ;;  %vm880_vm8 = vcmask 589312   ;;  %vm887_vm9 = vcmask 654912  }
   0x8   :  { %2293 = vmatprep.subr.bf16.mxu0 %v2442_v10  ;;  %2325 = vmatprep.subr.bf16.mxu1 %v2443_v11  ;;  %v2451_v22 = vld [vmem:[%s3489_s3 + $0x60] sm:$0xff]   ;;  %v2602_v23 = vld [vmem:[%s3488_s0 + $0x18] sm:$0xff]   ;;  %v2453_v24 = vld [vmem:[%s3489_s3 + $0x68] sm:$0xff]   ;;  %vm894_vm10 = vcmask 720512   ;;  %vm901_vm11 = vcmask 786112   ;;  %vm908_vm12 = vcmask 851712  }
   0x9   :  { %v2619_v25 = vld [vmem:[%s3488_s0 + $0x20] sm:$0xff]   ;;  %v2630_v26 = vld [vmem:[%s3488_s0 + $0x28] sm:$0xff]   ;;  %v2641_v27 = vld [vmem:[%s3488_s0 + $0x30] sm:$0xff]   ;;  %vm915_vm13 = vcmask 917312   ;;  %vm922_vm14 = vcmask 982912   ;;  %vm929_vm15 = vcmask 1048512  }
   0xa   :  { %2129 = vmatmul.mubr.msk.bf16.vlgmr.msra.gmra.mrb[0].mxu0 %vm163_vm0, %v2530_v5  ;;  %2137 = vmatmul.mubr.msk.bf16.vlgmr.msra.gmra.mrb[0].mxu1 %vm163_vm0, %v2530_v5  ;;  %v2652_v28 = vld [vmem:[%s3488_s0 + $0x38] sm:$0xff]   ;;  %v2454_v29 = vld [vmem:[%s3489_s3 + $0x30] sm:$0xff]   ;;  %v2676_v33 = vld [vmem:[%s3489_s3 + $0x80] sm:$0xff]  }
   0xb   :  { %230 = vmatprep.mubr.bf16.mxu0 %v2482_v1  ;;  %2294 = vmatpush3.bf16.msra.mxu0 %v2442_v10  ;;  %v2455_v30 = vld [vmem:[%s3489_s3 + $0x70] sm:$0xff]   ;;  %v2456_v31 = vld [vmem:[%s3489_s3 + $0x38] sm:$0xff]   ;;  %v2681_v34 = vld [vmem:[%s3489_s3 + $0xc0] sm:$0xff]  }
   0xc   :  { %2295 = vmatprep.subr.bf16.mxu0 %v2444_v12  ;;  %343 = vmatprep.mubr.bf16.mxu1 %v2482_v1  ;;  %v2457_v32 = vld [vmem:[%s3489_s3 + $0x78] sm:$0xff]   ;;  %v61_v38 = vld [vmem:[%s3490_s2] sm:$0xf] }
   0xd   :  { %2326 = vmatpush3.bf16.msra.mxu1 %v2443_v11  ;;  %v2693_v40 = vrot.slane %v61_v38, %v65_v37  ;;  %v2695_v41 = vrot.slane %v61_v38, %v69_v39  ;;  %v2701_v49 = vrot.slane %v61_v38, %v73_v42  ;;  %v2704_v52 = vrot.slane %v61_v38, %v77_v43  ;;  %v2460_v38 = vld [vmem:[%s3489_s3 + $0x88] sm:$0xff]  }
   0xe   :  { %2327 = vmatprep.subr.bf16.mxu1 %v2445_v14 }
   0xf   :  { %2296 = vmatpush3.bf16.msra.mxu0 %v2444_v12 }
  0x10   :  { %2297 = vmatprep.subr.bf16.mxu0 %v2446_v15 }
  0x11   :  { %2328 = vmatpush3.bf16.msra.mxu1 %v2445_v14 }
  0x12   :  { %2130 = vmatmul.mubr.msk.bf16.gmra.mrb[4].mxu0 %vm163_vm0, %v2559_v13  ;;  %2329 = vmatprep.subr.bf16.mxu1 %v2447_v17 }
  0x13   :  { %240 = vmatprep.mubr.bf16.mxu0 %v2482_v1  ;;  %2298 = vmatpush3.bf16.msra.mxu0 %v2446_v15 }
  0x14   :  { %2299 = vmatprep.subr.bf16.mxu0 %v2448_v16  ;;  %2138 = vmatmul.mubr.msk.bf16.gmra.mrb[4].mxu1 %vm163_vm0, %v2559_v13 }
  0x15   :  { %353 = vmatprep.mubr.bf16.mxu1 %v2482_v1  ;;  %2330 = vmatpush3.bf16.msra.mxu1 %v2447_v17 }
  0x16   :  { %2331 = vmatprep.subr.bf16.mxu1 %v2449_v19 }
  0x17   :  { %2300 = vmatpush3.bf16.msra.mxu0 %v2448_v16 }
  0x18   :  { %2301 = vmatprep.subr.bf16.mxu0 %v2450_v20 }
  0x19   :  { %2332 = vmatpush3.bf16.msra.mxu1 %v2449_v19 }
  0x1a   :  { %2131 = vmatmul.mubr.msk.bf16.gmra.mrb[8].mxu0 %vm163_vm0, %v2581_v18  ;;  %2333 = vmatprep.subr.bf16.mxu1 %v2451_v22 }
  0x1b   :  { %250 = vmatprep.mubr.bf16.mxu0 %v2482_v1  ;;  %2302 = vmatpush3.bf16.msra.mxu0 %v2450_v20 }
  0x1c   :  { %2303 = vmatprep.subr.bf16.mxu0 %v2452_v21  ;;  %2139 = vmatmul.mubr.msk.bf16.gmra.mrb[8].mxu1 %vm163_vm0, %v2581_v18 }
  0x1d   :  { %363 = vmatprep.mubr.bf16.mxu1 %v2482_v1  ;;  %2334 = vmatpush3.bf16.msra.mxu1 %v2451_v22 }
  0x1e   :  { %2335 = vmatprep.subr.bf16.mxu1 %v2453_v24 }
  0x1f   :  { %2304 = vmatpush3.bf16.msra.mxu0 %v2452_v21 }
  0x20   :  { %2305 = vmatprep.subr.bf16.mxu0 %v2454_v29 }
  0x21   :  { %2336 = vmatpush3.bf16.msra.mxu1 %v2453_v24 }
  0x22   :  { %2132 = vmatmul.mubr.msk.bf16.gmra.mrb[12].mxu0 %vm163_vm0, %v2602_v23  ;;  %2337 = vmatprep.subr.bf16.mxu1 %v2455_v30 }
  0x23   :  { %260 = vmatprep.mubr.bf16.mxu0 %v2482_v1  ;;  %2306 = vmatpush3.bf16.msra.mxu0 %v2454_v29 }
  0x24   :  { %2140 = vmatmul.mubr.msk.bf16.gmra.mrb[12].mxu1 %vm163_vm0, %v2602_v23  ;;  %2307 = vmatprep.subr.bf16.mxu0 %v2456_v31 }
  0x25   :  { %373 = vmatprep.mubr.bf16.mxu1 %v2482_v1  ;;  %2338 = vmatpush3.bf16.msra.mxu1 %v2455_v30 }
  0x26   :  { %2339 = vmatprep.subr.bf16.mxu1 %v2457_v32 }
  0x27   :  { %2308 = vmatpush3.bf16.msra.mxu0 %v2456_v31 }
  0x28   :  { %2357 = vmatprep.subr.bf16.mxu0 %v2676_v33 }
  0x29   :  { %2340 = vmatpush3.bf16.msra.mxu1 %v2457_v32 }
  0x2a   :  { %2133 = vmatmul.mubr.msk.bf16.gmra.mrb[16].mxu0 %vm163_vm0, %v2619_v25  ;;  %2389 = vmatprep.subr.bf16.mxu1 %v2681_v34 }
  0x2b   :  { %270 = vmatprep.mubr.bf16.mxu0 %v2482_v1 }
  0x2c   :  { %2141 = vmatmul.mubr.msk.bf16.gmra.mrb[16].mxu1 %vm163_vm0, %v2619_v25 }
  0x2d   :  { %383 = vmatprep.mubr.bf16.mxu1 %v2482_v1 }
  0x32   :  { %2134 = vmatmul.mubr.msk.bf16.gmra.mrb[20].mxu0 %vm163_vm0, %v2630_v26 }
  0x33   :  { %280 = vmatprep.mubr.bf16.mxu0 %v2482_v1 }
  0x34   :  { %2142 = vmatmul.mubr.msk.bf16.gmra.mrb[20].mxu1 %vm163_vm0, %v2630_v26 }
  0x35   :  { %393 = vmatprep.mubr.bf16.mxu1 %v2482_v1 }
  0x3a   :  { %2135 = vmatmul.mubr.msk.bf16.gmra.mrb[24].mxu0 %vm163_vm0, %v2641_v27 }
  0x3b   :  { %290 = vmatprep.mubr.bf16.mxu0 %v2482_v1 }
  0x3c   :  { %2143 = vmatmul.mubr.msk.bf16.gmra.mrb[24].mxu1 %vm163_vm0, %v2641_v27 }
  0x3d   :  { %403 = vmatprep.mubr.bf16.mxu1 %v2482_v1 }
  0x42   :  { %2136 = vmatmul.mubr.msk.bf16.gmra.mrb[28].mxu0 %vm163_vm0, %v2652_v28 }
  0x44   :  { %2144 = vmatmul.mubr.msk.bf16.gmra.mrb[28].mxu1 %vm163_vm0, %v2652_v28 }
  0xdd   :  { %v222_v44 = vpop.f32.mrb[0].mxu0  ;;  %v335_v56 = vpop.f32.mrb[0].mxu1 }
  0xde   :  { %v223_v45 = vadd.f32 %v222_v44, %v2693_v40  ;;  %v224_v46 = vpop.f32.mrb[1].mxu0  ;;  %v336_v59 = vadd.f32 %v335_v56, %v2701_v49  ;;  %v337_v60 = vpop.f32.mrb[1].mxu1 }
  0xdf   :  { %v225_v47 = vadd.f32 %v224_v46, %v2695_v41  ;;  %v226_v48 = vpop.f32.mrb[2].mxu0  ;;  %v338_v62 = vadd.f32 %v337_v60, %v2704_v52  ;;  %v339_v63 = vpop.f32.mrb[2].mxu1  ;;  %v2462_v60 = vld [vmem:[%s3489_s3 + $0x90] sm:$0xff]  }
  0xe0   :  { %v227_v50 = vadd.f32 %v226_v48, %v2693_v40  ;;  %v228_v51 = vpop.f32.mrb[3].mxu0  ;;  %v414_v54 = vmax.f32 %v223_v45, 0.0  ;;  %v416_v2 = vmax.f32 %v336_v59, 0.0  ;;  %v340_v3 = vadd.f32 %v339_v63, %v2701_v49  ;;  %v341_v4 = vpop.f32.mrb[3].mxu1  ;;  %v2461_v45 = vld [vmem:[%s3489_s3 + $0xc8] sm:$0xff]   ;;  %v2463_v63 = vld [vmem:[%s3489_s3 + $0xd0] sm:$0xff]  }
  0xe1   :  { %v229_v53 = vadd.f32 %v228_v51, %v2695_v41  ;;  %v415_v57 = vmax.f32 %v225_v47, 0.0  ;;  %v417_v8 = vmax.f32 %v338_v62, 0.0  ;;  %v342_v9 = vadd.f32 %v341_v4, %v2704_v52 }
  0xe2   :  { %v418_v55 = vmax.f32 %v227_v50, 0.0  ;;  %v420_v12 = vmax.f32 %v340_v3, 0.0 }
  0xe3   :  { %v419_v58 = vmax.f32 %v229_v53, 0.0  ;;  %v421_v16 = vmax.f32 %v342_v9, 0.0  ;;  %v2464_v9 = vld [vmem:[%s3489_s3 + $0x98] sm:$0xff]  }
  0xe4   :  { %v478_v61 = vpack.c.bf16 %v418_v55, %v414_v54  ;;  %v2715_v19 = vpack.c.bf16 %v420_v12, %v416_v2 }
  0xe5   :  { %v479_v0 = vpack.c.bf16 %v419_v58, %v415_v57  ;;  %v232_v1 = vpop.f32.mrb[4].mxu0  ;;  %v2717_v22 = vpack.c.bf16 %v421_v16, %v417_v8 }
  0xe6   :  { %v233_v6 = vadd.f32 %v232_v1, %v2693_v40  ;;  %v234_v7 = vpop.f32.mrb[5].mxu0  ;;  %2309 = vmatprep.mubr.bf16.mxu0 %v478_v61 }
  0xe7   :  { %v235_v10 = vadd.f32 %v234_v7, %v2695_v41  ;;  %v236_v11 = vpop.f32.mrb[6].mxu0  ;;  %2341 = vmatprep.mubr.bf16.mxu1 %v479_v0  ;;  %v345_v24 = vpop.f32.mrb[4].mxu1 }
  0xe8   :  { %v237_v14 = vadd.f32 %v236_v11, %v2693_v40  ;;  %v238_v15 = vpop.f32.mrb[7].mxu0  ;;  %v422_v20 = vmax.f32 %v233_v6, 0.0  ;;  %v346_v31 = vadd.f32 %v345_v24, %v2701_v49  ;;  %v347_v32 = vpop.f32.mrb[5].mxu1 }
  0xe9   :  { %v239_v17 = vadd.f32 %v238_v15, %v2695_v41  ;;  %v423_v29 = vmax.f32 %v235_v10, 0.0  ;;  %v348_v39 = vadd.f32 %v347_v32, %v2704_v52  ;;  %v349_v42 = vpop.f32.mrb[6].mxu1  ;;  %v2465_v15 = vld [vmem:[%s3489_s3 + $0xd8] sm:$0xff]  }
  0xea   :  { %v426_v21 = vmax.f32 %v237_v14, 0.0  ;;  %v424_v46 = vmax.f32 %v346_v31, 0.0  ;;  %v350_v47 = vadd.f32 %v349_v42, %v2701_v49  ;;  %v351_v48 = vpop.f32.mrb[7].mxu1  ;;  %v2466_v42 = vld [vmem:[%s3489_s3 + $0xa0] sm:$0xff]  }
  0xeb   :  { %v427_v30 = vmax.f32 %v239_v17, 0.0  ;;  %v425_v53 = vmax.f32 %v348_v39, 0.0  ;;  %v352_v54 = vadd.f32 %v351_v48, %v2704_v52 }
  0xec   :  { %v482_v37 = vpack.c.bf16 %v426_v21, %v422_v20  ;;  %v428_v57 = vmax.f32 %v350_v47, 0.0 }
  0xed   :  { %v483_v43 = vpack.c.bf16 %v427_v30, %v423_v29  ;;  %v242_v44 = vpop.f32.mrb[8].mxu0  ;;  %v429_v61 = vmax.f32 %v352_v54, 0.0 }
  0xee   :  { %v243_v50 = vadd.f32 %v242_v44, %v2693_v40  ;;  %v244_v51 = vpop.f32.mrb[9].mxu0  ;;  %2310 = vmatmul.mubr.bf16.vlgmr.msra.gmra.mrb[32].mxu0 %v482_v37 }
  0xef   :  { %v245_v55 = vadd.f32 %v244_v51, %v2695_v41  ;;  %v246_v56 = vpop.f32.mrb[10].mxu0  ;;  %2342 = vmatmul.mubr.bf16.vlgmr.msra.gmra.mrb[32].mxu1 %v483_v43  ;;  %2358 = vmatpush3.bf16.msra.mxu0 %v2676_v33  ;;  %v2741_v33 = vpack.c.bf16 %v428_v57, %v424_v46  ;;  %v2743_v2 = vpack.c.bf16 %v429_v61, %v425_v53 }
  0xf0   :  { %v247_v58 = vadd.f32 %v246_v56, %v2693_v40  ;;  %v248_v59 = vpop.f32.mrb[11].mxu0  ;;  %2390 = vmatpush3.bf16.msra.mxu1 %v2681_v34  ;;  %2359 = vmatprep.subr.bf16.mxu0 %v2460_v38  ;;  %v430_v0 = vmax.f32 %v243_v50, 0.0  ;;  %v355_v34 = vpop.f32.mrb[8].mxu1 }
  0xf1   :  { %v249_v62 = vadd.f32 %v248_v59, %v2695_v41  ;;  %2391 = vmatprep.subr.bf16.mxu1 %v2461_v45  ;;  %v431_v3 = vmax.f32 %v245_v55, 0.0  ;;  %v356_v6 = vadd.f32 %v355_v34, %v2701_v49  ;;  %v357_v7 = vpop.f32.mrb[9].mxu1 }
  0xf2   :  { %v434_v1 = vmax.f32 %v247_v58, 0.0  ;;  %v358_v10 = vadd.f32 %v357_v7, %v2704_v52  ;;  %v359_v11 = vpop.f32.mrb[10].mxu1  ;;  %v2468_v58 = vld [vmem:[%s3489_s3 + $0xa8] sm:$0xff]  }
  0xf3   :  { %v435_v4 = vmax.f32 %v249_v62, 0.0  ;;  %2360 = vmatpush3.bf16.msra.mxu0 %v2460_v38  ;;  %v432_v16 = vmax.f32 %v356_v6, 0.0  ;;  %v360_v17 = vadd.f32 %v359_v11, %v2701_v49  ;;  %v361_v20 = vpop.f32.mrb[11].mxu1 }
  0xf4   :  { %v486_v8 = vpack.c.bf16 %v434_v1, %v430_v0  ;;  %2392 = vmatpush3.bf16.msra.mxu1 %v2461_v45  ;;  %2361 = vmatprep.subr.bf16.mxu0 %v2462_v60  ;;  %v433_v29 = vmax.f32 %v358_v10, 0.0  ;;  %v362_v30 = vadd.f32 %v361_v20, %v2704_v52  ;;  %v2467_v45 = vld [vmem:[%s3489_s3 + $0xe0] sm:$0xff]  }
  0xf5   :  { %v487_v12 = vpack.c.bf16 %v435_v4, %v431_v3  ;;  %v252_v14 = vpop.f32.mrb[12].mxu0  ;;  %2393 = vmatprep.subr.bf16.mxu1 %v2463_v63  ;;  %v436_v37 = vmax.f32 %v360_v17, 0.0  ;;  %v2471_v17 = vld [vmem:[%s3489_s3 + $0xf0] sm:$0xff]  }
  0xf6   :  { %v253_v21 = vadd.f32 %v252_v14, %v2693_v40  ;;  %v254_v24 = vpop.f32.mrb[13].mxu0  ;;  %2313 = vmatprep.mubr.bf16.mxu0 %v486_v8  ;;  %v437_v43 = vmax.f32 %v362_v30, 0.0  ;;  %v2470_v14 = vld [vmem:[%s3489_s3 + $0xb0] sm:$0xff]  }
  0xf7   :  { %v255_v31 = vadd.f32 %v254_v24, %v2695_v41  ;;  %v256_v32 = vpop.f32.mrb[14].mxu0  ;;  %2345 = vmatprep.mubr.bf16.mxu1 %v487_v12  ;;  %2362 = vmatpush3.bf16.msra.mxu0 %v2462_v60  ;;  %v2765_v46 = vpack.c.bf16 %v436_v37, %v432_v16  ;;  %v365_v51 = vpop.f32.mrb[12].mxu1 }
  0xf8   :  { %v257_v38 = vadd.f32 %v256_v32, %v2693_v40  ;;  %v258_v39 = vpop.f32.mrb[15].mxu0  ;;  %2394 = vmatpush3.bf16.msra.mxu1 %v2463_v63  ;;  %2363 = vmatprep.subr.bf16.mxu0 %v2464_v9  ;;  %v438_v47 = vmax.f32 %v253_v21, 0.0  ;;  %v2767_v50 = vpack.c.bf16 %v437_v43, %v433_v29  ;;  %v366_v55 = vadd.f32 %v365_v51, %v2701_v49  ;;  %v367_v56 = vpop.f32.mrb[13].mxu1  ;;  %v2469_v63 = vld [vmem:[%s3489_s3 + $0xe8] sm:$0xff]  }
  0xf9   :  { %v259_v44 = vadd.f32 %v258_v39, %v2695_v41  ;;  %2395 = vmatprep.subr.bf16.mxu1 %v2465_v15  ;;  %v439_v53 = vmax.f32 %v255_v31, 0.0  ;;  %v368_v59 = vadd.f32 %v367_v56, %v2704_v52  ;;  %v369_v60 = vpop.f32.mrb[14].mxu1 }
  0xfa   :  { %v442_v48 = vmax.f32 %v257_v38, 0.0  ;;  %v440_v0 = vmax.f32 %v366_v55, 0.0  ;;  %v370_v1 = vadd.f32 %v369_v60, %v2701_v49  ;;  %v371_v34 = vpop.f32.mrb[15].mxu1 }
  0xfb   :  { %v443_v54 = vmax.f32 %v259_v44, 0.0  ;;  %2364 = vmatpush3.bf16.msra.mxu0 %v2464_v9  ;;  %v441_v6 = vmax.f32 %v368_v59, 0.0  ;;  %v372_v7 = vadd.f32 %v371_v34, %v2704_v52 }
  0xfc   :  { %v490_v57 = vpack.c.bf16 %v442_v48, %v438_v47  ;;  %2396 = vmatpush3.bf16.msra.mxu1 %v2465_v15  ;;  %2365 = vmatprep.subr.bf16.mxu0 %v2466_v42  ;;  %v444_v10 = vmax.f32 %v370_v1, 0.0  ;;  %v2473_v48 = vld [vmem:[%s3489_s3 + $0xf8] sm:$0xff]  }
  0xfd   :  { %v491_v61 = vpack.c.bf16 %v443_v54, %v439_v53  ;;  %v262_v62 = vpop.f32.mrb[16].mxu0  ;;  %2397 = vmatprep.subr.bf16.mxu1 %v2467_v45  ;;  %v445_v15 = vmax.f32 %v372_v7, 0.0 }
  0xfe   :  { %v263_v3 = vadd.f32 %v262_v62, %v2693_v40  ;;  %v264_v4 = vpop.f32.mrb[17].mxu0  ;;  %2314 = vmatmul.mubr.bf16.gmra.mrb[36].mxu0 %v490_v57  ;;  %v2789_v20 = vpack.c.bf16 %v444_v10, %v440_v0 }
  0xff   :  { %v265_v8 = vadd.f32 %v264_v4, %v2695_v41  ;;  %v266_v9 = vpop.f32.mrb[18].mxu0  ;;  %2346 = vmatmul.mubr.bf16.gmra.mrb[36].mxu1 %v491_v61  ;;  %2366 = vmatpush3.bf16.msra.mxu0 %v2466_v42  ;;  %v2791_v29 = vpack.c.bf16 %v445_v15, %v441_v6  ;;  %v375_v30 = vpop.f32.mrb[16].mxu1  ;;  %v2472_v42 = vld [vmem:[%s3489_s3 + $0xb8] sm:$0xff]  }
 0x100   :  { %v267_v11 = vadd.f32 %v266_v9, %v2693_v40  ;;  %v268_v12 = vpop.f32.mrb[19].mxu0  ;;  %2398 = vmatpush3.bf16.msra.mxu1 %v2467_v45  ;;  %2367 = vmatprep.subr.bf16.mxu0 %v2468_v58  ;;  %v446_v21 = vmax.f32 %v263_v3, 0.0  ;;  %v376_v37 = vadd.f32 %v375_v30, %v2701_v49  ;;  %v377_v38 = vpop.f32.mrb[17].mxu1 }
 0x101   :  { %v269_v16 = vadd.f32 %v268_v12, %v2695_v41  ;;  %2399 = vmatprep.subr.bf16.mxu1 %v2469_v63  ;;  %v447_v31 = vmax.f32 %v265_v8, 0.0  ;;  %v378_v43 = vadd.f32 %v377_v38, %v2704_v52  ;;  %v379_v44 = vpop.f32.mrb[18].mxu1 }
 0x102   :  { %v450_v24 = vmax.f32 %v267_v11, 0.0  ;;  %v448_v51 = vmax.f32 %v376_v37, 0.0  ;;  %v380_v53 = vadd.f32 %v379_v44, %v2701_v49  ;;  %v381_v54 = vpop.f32.mrb[19].mxu1 }
 0x103   :  { %v451_v32 = vmax.f32 %v269_v16, 0.0  ;;  %2368 = vmatpush3.bf16.msra.mxu0 %v2468_v58  ;;  %v449_v57 = vmax.f32 %v378_v43, 0.0  ;;  %v382_v58 = vadd.f32 %v381_v54, %v2704_v52 }
 0x104   :  { %v494_v39 = vpack.c.bf16 %v450_v24, %v446_v21  ;;  %2400 = vmatpush3.bf16.msra.mxu1 %v2469_v63  ;;  %2369 = vmatprep.subr.bf16.mxu0 %v2470_v14  ;;  %v452_v61 = vmax.f32 %v380_v53, 0.0 }
 0x105   :  { %v495_v45 = vpack.c.bf16 %v451_v32, %v447_v31  ;;  %v272_v47 = vpop.f32.mrb[20].mxu0  ;;  %2401 = vmatprep.subr.bf16.mxu1 %v2471_v17  ;;  %v453_v0 = vmax.f32 %v382_v58, 0.0 }
 0x106   :  { %v273_v55 = vadd.f32 %v272_v47, %v2693_v40  ;;  %v274_v56 = vpop.f32.mrb[21].mxu0  ;;  %2317 = vmatprep.mubr.bf16.mxu0 %v494_v39  ;;  %v2807_v34 = vpack.c.bf16 %v452_v61, %v448_v51 }
 0x107   :  { %v275_v59 = vadd.f32 %v274_v56, %v2695_v41  ;;  %v276_v60 = vpop.f32.mrb[22].mxu0  ;;  %2349 = vmatprep.mubr.bf16.mxu1 %v495_v45  ;;  %2370 = vmatpush3.bf16.msra.mxu0 %v2470_v14  ;;  %v2809_v6 = vpack.c.bf16 %v453_v0, %v449_v57  ;;  %v385_v7 = vpop.f32.mrb[20].mxu1 }
 0x108   :  { %v277_v62 = vadd.f32 %v276_v60, %v2693_v40  ;;  %v278_v63 = vpop.f32.mrb[23].mxu0  ;;  %2402 = vmatpush3.bf16.msra.mxu1 %v2471_v17  ;;  %2371 = vmatprep.subr.bf16.mxu0 %v2472_v42  ;;  %v454_v3 = vmax.f32 %v273_v55, 0.0  ;;  %v386_v10 = vadd.f32 %v385_v7, %v2701_v49  ;;  %v387_v11 = vpop.f32.mrb[21].mxu1 }
 0x109   :  { %v279_v1 = vadd.f32 %v278_v63, %v2695_v41  ;;  %2403 = vmatprep.subr.bf16.mxu1 %v2473_v48  ;;  %v455_v8 = vmax.f32 %v275_v59, 0.0  ;;  %v388_v14 = vadd.f32 %v387_v11, %v2704_v52  ;;  %v389_v15 = vpop.f32.mrb[22].mxu1 }
 0x10a   :  { %v458_v4 = vmax.f32 %v277_v62, 0.0  ;;  %v456_v21 = vmax.f32 %v386_v10, 0.0  ;;  %v390_v24 = vadd.f32 %v389_v15, %v2701_v49  ;;  %v391_v30 = vpop.f32.mrb[23].mxu1 }
 0x10b   :  { %v459_v9 = vmax.f32 %v279_v1, 0.0  ;;  %2372 = vmatpush3.bf16.msra.mxu0 %v2472_v42  ;;  %v457_v37 = vmax.f32 %v388_v14, 0.0  ;;  %v392_v38 = vadd.f32 %v391_v30, %v2704_v52 }
 0x10c   :  { %v498_v12 = vpack.c.bf16 %v458_v4, %v454_v3  ;;  %2404 = vmatpush3.bf16.msra.mxu1 %v2473_v48  ;;  %v460_v43 = vmax.f32 %v390_v24, 0.0 }
 0x10d   :  { %v499_v16 = vpack.c.bf16 %v459_v9, %v455_v8  ;;  %v282_v17 = vpop.f32.mrb[24].mxu0  ;;  %v461_v47 = vmax.f32 %v392_v38, 0.0 }
 0x10e   :  { %v283_v31 = vadd.f32 %v282_v17, %v2693_v40  ;;  %v284_v32 = vpop.f32.mrb[25].mxu0  ;;  %2318 = vmatmul.mubr.bf16.gmra.mrb[40].mxu0 %v498_v12  ;;  %v2819_v51 = vpack.c.bf16 %v460_v43, %v456_v21 }
 0x10f   :  { %v285_v39 = vadd.f32 %v284_v32, %v2695_v41  ;;  %v286_v42 = vpop.f32.mrb[26].mxu0  ;;  %2350 = vmatmul.mubr.bf16.gmra.mrb[40].mxu1 %v499_v16  ;;  %v501_v55 = vpack.c.bf16 %v461_v47, %v457_v37  ;;  %v395_v56 = vpop.f32.mrb[24].mxu1 }
 0x110   :  { %v287_v44 = vadd.f32 %v286_v42, %v2693_v40  ;;  %v288_v45 = vpop.f32.mrb[27].mxu0  ;;  %v462_v53 = vmax.f32 %v283_v31, 0.0  ;;  %v396_v59 = vadd.f32 %v395_v56, %v2701_v49  ;;  %v397_v60 = vpop.f32.mrb[25].mxu1 }
 0x111   :  { %v289_v48 = vadd.f32 %v288_v45, %v2695_v41  ;;  %v463_v57 = vmax.f32 %v285_v39, 0.0  ;;  %v398_v62 = vadd.f32 %v397_v60, %v2704_v52  ;;  %v399_v63 = vpop.f32.mrb[26].mxu1 }
 0x112   :  { %v466_v54 = vmax.f32 %v287_v44, 0.0  ;;  %v464_v3 = vmax.f32 %v396_v59, 0.0  ;;  %v400_v4 = vadd.f32 %v399_v63, %v2701_v49  ;;  %v401_v7 = vpop.f32.mrb[27].mxu1  ;;  %v2892_v63 = vunpack.c.h.bf16 %v2581_v18 }
 0x113   :  { %v467_v58 = vmax.f32 %v289_v48, 0.0  ;;  %v465_v10 = vmax.f32 %v398_v62, 0.0  ;;  %v402_v11 = vadd.f32 %v401_v7, %v2704_v52  ;;  %v2889_v62 = vunpack.c.h.bf16 %v2602_v23 }
 0x114   :  { %v502_v61 = vpack.c.bf16 %v466_v54, %v462_v53  ;;  %v468_v15 = vmax.f32 %v400_v4, 0.0 }
 0x115   :  { %v503_v0 = vpack.c.bf16 %v467_v58, %v463_v57  ;;  %v292_v1 = vpop.f32.mrb[28].mxu0  ;;  %v469_v21 = vmax.f32 %v402_v11, 0.0  ;;  %v2917_v11 = vunpack.c.h.bf16 %v2630_v26 }
 0x116   :  { %v293_v8 = vadd.f32 %v292_v1, %v2693_v40  ;;  %v294_v9 = vpop.f32.mrb[29].mxu0  ;;  %2321 = vmatprep.mubr.bf16.mxu0 %v502_v61  ;;  %v504_v30 = vpack.c.bf16 %v468_v15, %v464_v3 }
 0x117   :  { %v295_v12 = vadd.f32 %v294_v9, %v2695_v41  ;;  %v296_v14 = vpop.f32.mrb[30].mxu0  ;;  %2353 = vmatprep.mubr.bf16.mxu1 %v503_v0  ;;  %v505_v37 = vpack.c.bf16 %v469_v21, %v465_v10  ;;  %v405_v38 = vpop.f32.mrb[28].mxu1  ;;  %v2911_v9 = vunpack.c.l.bf16 %v2630_v26  ;;  %v2914_v10 = vunpack.c.l.bf16 %v2619_v25 }
 0x118   :  { %v297_v16 = vadd.f32 %v296_v14, %v2693_v40  ;;  %v298_v17 = vpop.f32.mrb[31].mxu0  ;;  %v470_v31 = vmax.f32 %v293_v8, 0.0  ;;  %v406_v43 = vadd.f32 %v405_v38, %v2701_v49  ;;  %v407_v44 = vpop.f32.mrb[29].mxu1 }
 0x119   :  { %v299_v24 = vadd.f32 %v298_v17, %v2695_v41  ;;  %v471_v39 = vmax.f32 %v295_v12, 0.0  ;;  %v408_v47 = vadd.f32 %v407_v44, %v2704_v52  ;;  %v409_v48 = vpop.f32.mrb[30].mxu1  ;;  %v2920_v12 = vunpack.c.h.bf16 %v2619_v25 }
 0x11a   :  { %v474_v32 = vmax.f32 %v297_v16, 0.0  ;;  %v472_v40 = vmax.f32 %v406_v43, 0.0  ;;  %v410_v54 = vadd.f32 %v409_v48, %v2701_v49  ;;  %v411_v56 = vpop.f32.mrb[31].mxu1  ;;  %v2845_v49 = vunpack.c.l.bf16 %v2530_v5  ;;  %v2974_v48 = vld [vmem:[%s3491_s4 + $0x1] ss:$0 sm:$0xff] }
 0x11b   :  { %v475_v42 = vmax.f32 %v299_v24, 0.0  ;;  %v473_v41 = vmax.f32 %v408_v47, 0.0  ;;  %v412_v57 = vadd.f32 %v411_v56, %v2704_v52  ;;  %v2848_v52 = vunpack.c.l.bf16 %v2559_v13  ;;  %v2969_v47 = vld [vmem:[%s3491_s4] ss:$0 sm:$0xff] }
 0x11c   :  { %v506_v45 = vpack.c.bf16 %v474_v32, %v470_v31  ;;  %v476_v58 = vmax.f32 %v410_v54, 0.0  ;;  %v2942_v31 = vunpack.c.l.bf16 %v2641_v27  ;;  %v2945_v32 = vunpack.c.h.bf16 %v2652_v28 }
 0x11d   :  { %v507_v53 = vpack.c.bf16 %v475_v42, %v471_v39  ;;  %v477_v59 = vmax.f32 %v412_v57, 0.0  ;;  %v1102_v54 = vsub.f32 %v2848_v52, %v2974_v48 }
 0x11e   :  { %2322 = vmatmul.mubr.bf16.gmra.mrb[44].mxu0 %v506_v45  ;;  %v508_v60 = vpack.c.bf16 %v476_v58, %v472_v40  ;;  %v676_v40 = vsub.f32 %v2845_v49, %v2969_v47 }
 0x11f   :  { %2354 = vmatmul.mubr.bf16.gmra.mrb[44].mxu1 %v507_v53  ;;  %2373 = vmatprep.mubr.bf16.mxu0 %v2715_v19  ;;  %v509_v61 = vpack.c.bf16 %v477_v59, %v473_v41  ;;  %v2851_v19 = vunpack.c.h.bf16 %v2530_v5  ;;  %v678_v53 = vsub.f32 %v2848_v52, %v2969_v47  ;;  %v1100_v41 = vsub.f32 %v2845_v49, %v2974_v48 }
 0x120   :  { %2405 = vmatprep.mubr.bf16.mxu1 %v2717_v22  ;;  %v2854_v22 = vunpack.c.h.bf16 %v2559_v13 }
 0x121   :  { %v677_v58 = vsub.f32 %v2851_v19, %v2969_v47  ;;  %v1101_v45 = vsub.f32 %v2851_v19, %v2974_v48 }
 0x122   :  { %v679_v56 = vsub.f32 %v2854_v22, %v2969_v47  ;;  %v1103_v59 = vsub.f32 %v2854_v22, %v2974_v48 }
 0x126   :  { %2374 = vmatmul.mubr.bf16.vlgmr.msra.gmra.mrb[48].mxu0 %v2741_v33  ;;  %v2859_v33 = vld [vmem:[%s3491_s4 + $0x2] ss:$0 sm:$0xff] }
 0x127   :  { %2406 = vmatmul.mubr.bf16.vlgmr.msra.gmra.mrb[48].mxu1 %v2743_v2  ;;  %2377 = vmatprep.mubr.bf16.mxu0 %v2765_v46  ;;  %v2864_v2 = vld [vmem:[%s3491_s4 + $0x3] ss:$0 sm:$0xff]  ;;  %v1494_v46 = vsub.f32 %v2848_v52, %v2859_v33  ;;  %v1492_v13 = vsub.f32 %v2845_v49, %v2859_v33  ;;  %v1499_v7 = vsub.f32 %v2889_v62, %v2859_v33 }
 0x128   :  { %2409 = vmatprep.mubr.bf16.mxu1 %v2767_v50  ;;  %v1886_v5 = vsub.f32 %v2848_v52, %v2864_v2  ;;  %v1884_v50 = vsub.f32 %v2845_v49, %v2864_v2 }
 0x12e   :  { %2378 = vmatmul.mubr.bf16.gmra.mrb[52].mxu0 %v2789_v20  ;;  %v1495_v20 = vsub.f32 %v2854_v22, %v2859_v33 }
 0x12f   :  { %2410 = vmatmul.mubr.bf16.gmra.mrb[52].mxu1 %v2791_v29  ;;  %2381 = vmatprep.mubr.bf16.mxu0 %v2807_v34  ;;  %v1887_v29 = vsub.f32 %v2854_v22, %v2864_v2  ;;  %v1493_v34 = vsub.f32 %v2851_v19, %v2859_v33 }
 0x130   :  { %2413 = vmatprep.mubr.bf16.mxu1 %v2809_v6  ;;  %v1885_v6 = vsub.f32 %v2851_v19, %v2864_v2 }
 0x136   :  { %2382 = vmatmul.mubr.bf16.gmra.mrb[56].mxu0 %v2819_v51  ;;  %v2883_v51 = vunpack.c.l.bf16 %v2602_v23  ;;  %v1891_v23 = vsub.f32 %v2889_v62, %v2864_v2 }
 0x137   :  { %2414 = vmatmul.mubr.bf16.gmra.mrb[56].mxu1 %v501_v55  ;;  %2385 = vmatprep.mubr.bf16.mxu0 %v504_v30  ;;  %v2886_v55 = vunpack.c.l.bf16 %v2581_v18  ;;  %v1497_v18 = vsub.f32 %v2892_v63, %v2859_v33  ;;  %v2939_v30 = vunpack.c.l.bf16 %v2652_v28 }
 0x138   :  { %2417 = vmatprep.mubr.bf16.mxu1 %v505_v37  ;;  %v1498_v0 = vsub.f32 %v2883_v51, %v2859_v33  ;;  %v1890_v1 = vsub.f32 %v2883_v51, %v2864_v2  ;;  %v2948_v37 = vunpack.c.h.bf16 %v2641_v27 }
 0x139   :  { %v1496_v3 = vsub.f32 %v2886_v55, %v2859_v33  ;;  %v1888_v4 = vsub.f32 %v2886_v55, %v2864_v2 }
 0x13e   :  { %2386 = vmatmul.mubr.bf16.gmra.mrb[60].mxu0 %v508_v60 }
 0x13f   :  { %2418 = vmatmul.mubr.bf16.gmra.mrb[60].mxu1 %v509_v61 }
 0x1c1   :  { %v2311_v57 = vpop.f32.mrb[32].mxu0 }
 0x1c2   :  { %v694_v60 = vsub.f32 %v678_v53, %v2311_v57  ;;  %v608_v61 = vpop.f32.mrb[33].mxu0  ;;  %v2343_v35 = vpop.f32.mrb[32].mxu1 }
 0x1c3   :  { %v692_v27 = vsub.f32 %v676_v40, %v608_v61  ;;  %v1118_v28 = vsub.f32 %v1102_v54, %v2343_v35  ;;  %v2312_v44 = vpop.f32.mrb[34].mxu0  ;;  %v1032_v43 = vpop.f32.mrb[33].mxu1 }
 0x1c4   :  { %v710_v42 = vmul.f32 %v694_v60, %v694_v60  ;;  %v695_v39 = vsub.f32 %v679_v56, %v2312_v44  ;;  %v1116_v38 = vsub.f32 %v1100_v41, %v1032_v43  ;;  %v611_v24 = vpop.f32.mrb[35].mxu0  ;;  %v2344_v25 = vpop.f32.mrb[34].mxu1 }
 0x1c5   :  { %v708_v26 = vmul.f32 %v692_v27, %v692_v27  ;;  %v693_v21 = vsub.f32 %v677_v58, %v611_v24  ;;  %v1119_v17 = vsub.f32 %v1103_v59, %v2344_v25  ;;  %v1035_v16 = vpop.f32.mrb[35].mxu1  ;;  %v1134_v14 = vmul.f32 %v1118_v28, %v1118_v28 }
 0x1c6   :  { %v711_v15 = vmul.f32 %v695_v39, %v695_v39  ;;  %v1117_v53 = vsub.f32 %v1101_v45, %v1035_v16  ;;  %v730_v57 = vsel %vm163_vm0, %v710_v42, 0.0  ;;  %v1132_v44 = vmul.f32 %v1116_v38, %v1116_v38 }
 0x1c7   :  { %731 = vadd.xlane.f32.xlu1 %v730_v57  ;;  %v724_v40 = vsel %vm163_vm0, %v708_v26, 0.0  ;;  %v1135_v35 = vmul.f32 %v1119_v17, %v1119_v17  ;;  %v1154_v43 = vsel %vm163_vm0, %v1134_v14, 0.0  ;;  %v682_v16 = vsub.f32 %v2883_v51, %v2969_v47 }
 0x1c8   :  { %725 = vadd.xlane.f32.xlu0 %v724_v40  ;;  %v733_v54 = vsel %vm163_vm0, %v711_v15, 0.0  ;;  %v1133_v24 = vmul.f32 %v1117_v53, %v1117_v53  ;;  %v709_v39 = vmul.f32 %v693_v21, %v693_v21  ;;  %v1148_v42 = vsel %vm163_vm0, %v1132_v44, 0.0 }
 0x1c9   :  { %v1157_v25 = vsel %vm163_vm0, %v1135_v35, 0.0  ;;  %v680_v17 = vsub.f32 %v2886_v55, %v2969_v47  ;;  %v1106_v15 = vsub.f32 %v2883_v51, %v2974_v48  ;;  %v1104_v14 = vsub.f32 %v2886_v55, %v2974_v48 }
 0x1ca   :  { %v683_v26 = vsub.f32 %v2889_v62, %v2969_v47  ;;  %v681_v21 = vsub.f32 %v2892_v63, %v2969_v47  ;;  %v1107_v28 = vsub.f32 %v2889_v62, %v2974_v48  ;;  %v1151_v41 = vsel %vm163_vm0, %v1133_v24, 0.0 }
 0x1cb   :  { %734 = vadd.xlane.f32.xlu1 %v733_v54  ;;  %v1105_v58 = vsub.f32 %v2892_v63, %v2974_v48  ;;  %v727_v57 = vsel %vm163_vm0, %v709_v39, 0.0 }
 0x1cc   :  { %1155 = vadd.xlane.f32.xlu0 %v1154_v43 }
 0x1cf   :  { %1158 = vadd.xlane.f32.xlu1 %v1157_v25 }
 0x1d0   :  { %1149 = vadd.xlane.f32.xlu0 %v1148_v42 }
 0x1d1   :  { %v2315_v38 = vpop.f32.mrb[36].mxu0 }
 0x1d2   :  { %v698_v27 = vsub.f32 %v682_v16, %v2315_v38  ;;  %v624_v45 = vpop.f32.mrb[37].mxu0  ;;  %v2347_v56 = vpop.f32.mrb[36].mxu1 }
 0x1d3   :  { %v696_v59 = vsub.f32 %v680_v17, %v624_v45  ;;  %v1122_v60 = vsub.f32 %v1106_v15, %v2347_v56  ;;  %v1048_v61 = vpop.f32.mrb[37].mxu1  ;;  %1152 = vadd.xlane.f32.xlu1 %v1151_v41  ;;  %v2316_v53 = vpop.f32.mrb[38].mxu0  ;;  %v1110_v41 = vsub.f32 %v2911_v9, %v2974_v48 }
 0x1d4   :  { %v714_v40 = vmul.f32 %v698_v27, %v698_v27  ;;  %v1120_v35 = vsub.f32 %v1104_v14, %v1048_v61  ;;  %v699_v54 = vsub.f32 %v683_v26, %v2316_v53  ;;  %v627_v44 = vpop.f32.mrb[39].mxu0  ;;  %v2348_v43 = vpop.f32.mrb[38].mxu1  ;;  %728 = vadd.xlane.f32.xlu0 %v727_v57  ;;  %v1108_v61 = vsub.f32 %v2914_v10, %v2974_v48 }
 0x1d5   :  { %v697_v25 = vsub.f32 %v681_v21, %v627_v44  ;;  %v1123_v16 = vsub.f32 %v1107_v28, %v2348_v43  ;;  %v1051_v42 = vpop.f32.mrb[39].mxu1  ;;  %v712_v17 = vmul.f32 %v696_v59, %v696_v59  ;;  %v1138_v39 = vmul.f32 %v1122_v60, %v1122_v60 }
 0x1d6   :  { %v715_v24 = vmul.f32 %v699_v54, %v699_v54  ;;  %v1121_v38 = vsub.f32 %v1105_v58, %v1051_v42  ;;  %v742_v8 = vsel %vm163_vm0, %v714_v40, 0.0  ;;  %v686_v21 = vsub.f32 %v2911_v9, %v2969_v47 }
 0x1d7   :  { %v713_v15 = vmul.f32 %v697_v25, %v697_v25  ;;  %v736_v14 = vsel %vm163_vm0, %v712_v17, 0.0  ;;  %v1139_v26 = vmul.f32 %v1123_v16, %v1123_v16  ;;  %v1136_v28 = vmul.f32 %v1120_v35, %v1120_v35 }
 0x1d8   :  { %743 = vadd.xlane.f32.xlu0 %v742_v8  ;;  %v745_v45 = vsel %vm163_vm0, %v715_v24, 0.0  ;;  %v1166_v56 = vsel %vm163_vm0, %v1138_v39, 0.0  ;;  %v684_v8 = vsub.f32 %v2914_v10, %v2969_v47  ;;  %v1137_v58 = vmul.f32 %v1121_v38, %v1121_v38 }
 0x1d9   :  { %746 = vadd.xlane.f32.xlu1 %v745_v45  ;;  %v739_v27 = vsel %vm163_vm0, %v713_v15, 0.0  ;;  %v1169_v59 = vsel %vm163_vm0, %v1139_v26, 0.0  ;;  %v687_v60 = vsub.f32 %v2917_v11, %v2969_v47  ;;  %v685_v57 = vsub.f32 %v2920_v12, %v2969_v47 }
 0x1da   :  { %v1111_v40 = vsub.f32 %v2917_v11, %v2974_v48  ;;  %v1109_v43 = vsub.f32 %v2920_v12, %v2974_v48  ;;  %v1160_v38 = vsel %vm163_vm0, %v1136_v28, 0.0  ;;  %v1163_v26 = vsel %vm163_vm0, %v1137_v58, 0.0 }
 0x1dc   :  { %737 = vadd.xlane.f32.xlu0 %v736_v14 }
 0x1dd   :  { %740 = vadd.xlane.f32.xlu1 %v739_v27 }
 0x1e0   :  { %1167 = vadd.xlane.f32.xlu0 %v1166_v56 }
 0x1e1   :  { %1170 = vadd.xlane.f32.xlu1 %v1169_v59  ;;  %v2319_v53 = vpop.f32.mrb[40].mxu0 }
 0x1e2   :  { %v702_v35 = vsub.f32 %v686_v21, %v2319_v53  ;;  %v640_v54 = vpop.f32.mrb[41].mxu0  ;;  %v2351_v44 = vpop.f32.mrb[40].mxu1 }
 0x1e3   :  { %v700_v25 = vsub.f32 %v684_v8, %v640_v54  ;;  %v1126_v16 = vsub.f32 %v1110_v41, %v2351_v44  ;;  %v2320_v42 = vpop.f32.mrb[42].mxu0  ;;  %v1064_v24 = vpop.f32.mrb[41].mxu1 }
 0x1e4   :  { %v718_v17 = vmul.f32 %v702_v35, %v702_v35  ;;  %v703_v15 = vsub.f32 %v687_v60, %v2320_v42  ;;  %v1124_v45 = vsub.f32 %v1108_v61, %v1064_v24  ;;  %v643_v39 = vpop.f32.mrb[43].mxu0  ;;  %v2352_v14 = vpop.f32.mrb[42].mxu1  ;;  %1161 = vadd.xlane.f32.xlu0 %v1160_v38  ;;  %v691_v24 = vsub.f32 %v2945_v32, %v2969_v47 }
 0x1e5   :  { %v701_v27 = vsub.f32 %v685_v57, %v643_v39  ;;  %v1127_v21 = vsub.f32 %v1111_v40, %v2352_v14  ;;  %v1067_v56 = vpop.f32.mrb[43].mxu1  ;;  %1164 = vadd.xlane.f32.xlu1 %v1163_v26  ;;  %v716_v41 = vmul.f32 %v700_v25, %v700_v25  ;;  %v1142_v60 = vmul.f32 %v1126_v16, %v1126_v16 }
 0x1e6   :  { %v719_v59 = vmul.f32 %v703_v15, %v703_v15  ;;  %v1125_v53 = vsub.f32 %v1109_v43, %v1067_v56  ;;  %v754_v8 = vsel %vm163_vm0, %v718_v17, 0.0  ;;  %v690_v57 = vsub.f32 %v2939_v30, %v2969_v47 }
 0x1e7   :  { %v717_v54 = vmul.f32 %v701_v27, %v701_v27  ;;  %v748_v61 = vsel %vm163_vm0, %v716_v41, 0.0  ;;  %v1143_v35 = vmul.f32 %v1127_v21, %v1127_v21  ;;  %v1140_v40 = vmul.f32 %v1124_v45, %v1124_v45 }
 0x1e8   :  { %755 = vadd.xlane.f32.xlu0 %v754_v8  ;;  %v757_v28 = vsel %vm163_vm0, %v719_v59, 0.0  ;;  %v1178_v44 = vsel %vm163_vm0, %v1142_v60, 0.0  ;;  %v688_v43 = vsub.f32 %v2942_v31, %v2969_v47  ;;  %v1114_v25 = vsub.f32 %v2939_v30, %v2974_v48 }
 0x1e9   :  { %758 = vadd.xlane.f32.xlu1 %v757_v28  ;;  %v751_v58 = vsel %vm163_vm0, %v717_v54, 0.0  ;;  %v1141_v16 = vmul.f32 %v1125_v53, %v1125_v53  ;;  %v1181_v42 = vsel %vm163_vm0, %v1143_v35, 0.0  ;;  %v1112_v38 = vsub.f32 %v2942_v31, %v2974_v48 }
 0x1ea   :  { %v689_v15 = vsub.f32 %v2948_v37, %v2969_v47  ;;  %v1115_v45 = vsub.f32 %v2945_v32, %v2974_v48  ;;  %v1113_v27 = vsub.f32 %v2948_v37, %v2974_v48  ;;  %v1172_v8 = vsel %vm163_vm0, %v1140_v40, 0.0 }
 0x1ec   :  { %749 = vadd.xlane.f32.xlu0 %v748_v61  ;;  %v1175_v61 = vsel %vm163_vm0, %v1141_v16, 0.0 }
 0x1ed   :  { %752 = vadd.xlane.f32.xlu1 %v751_v58 }
 0x1f0   :  { %1179 = vadd.xlane.f32.xlu0 %v1178_v44 }
 0x1f1   :  { %1182 = vadd.xlane.f32.xlu1 %v1181_v42  ;;  %v2323_v17 = vpop.f32.mrb[44].mxu0 }
 0x1f2   :  { %v706_v39 = vsub.f32 %v690_v57, %v2323_v17  ;;  %v656_v14 = vpop.f32.mrb[45].mxu0  ;;  %v2355_v26 = vpop.f32.mrb[44].mxu1 }
 0x1f3   :  { %v704_v21 = vsub.f32 %v688_v43, %v656_v14  ;;  %v1130_v56 = vsub.f32 %v1114_v25, %v2355_v26  ;;  %v2324_v59 = vpop.f32.mrb[46].mxu0  ;;  %v1080_v53 = vpop.f32.mrb[45].mxu1 }
 0x1f4   :  { %v722_v41 = vmul.f32 %v706_v39, %v706_v39  ;;  %v707_v54 = vsub.f32 %v691_v24, %v2324_v59  ;;  %v1128_v28 = vsub.f32 %v1112_v38, %v1080_v53  ;;  %v659_v60 = vpop.f32.mrb[47].mxu0  ;;  %v2356_v47 = vpop.f32.mrb[46].mxu1  ;;  %1173 = vadd.xlane.f32.xlu0 %v1172_v8 }
 0x1f5   :  { %v705_v35 = vsub.f32 %v689_v15, %v659_v60  ;;  %v1131_v58 = vsub.f32 %v1115_v45, %v2356_v47  ;;  %v1083_v57 = vpop.f32.mrb[47].mxu1  ;;  %1176 = vadd.xlane.f32.xlu1 %v1175_v61  ;;  %v720_v25 = vmul.f32 %v704_v21, %v704_v21  ;;  %v1146_v15 = vmul.f32 %v1130_v56, %v1130_v56 }
 0x1f6   :  { %v723_v44 = vmul.f32 %v707_v54, %v707_v54  ;;  %v1129_v48 = vsub.f32 %v1113_v27, %v1083_v57  ;;  %v766_v43 = vsel %vm163_vm0, %v722_v41, 0.0 }
 0x1f7   :  { %v721_v42 = vmul.f32 %v705_v35, %v705_v35  ;;  %v760_v45 = vsel %vm163_vm0, %v720_v25, 0.0  ;;  %v1147_v21 = vmul.f32 %v1131_v58, %v1131_v58 }
 0x1f8   :  { %767 = vadd.xlane.f32.xlu0 %v766_v43  ;;  %v769_v40 = vsel %vm163_vm0, %v723_v44, 0.0  ;;  %v1145_v41 = vmul.f32 %v1129_v48, %v1129_v48 }
 0x1f9   :  { %770 = vadd.xlane.f32.xlu1 %v769_v40  ;;  %v2375_v24 = vpop.f32.mrb[48].mxu0  ;;  %v763_v59 = vsel %vm163_vm0, %v721_v42, 0.0  ;;  %v1193_v54 = vsel %vm163_vm0, %v1147_v21, 0.0  ;;  %v3495_v40 = vsub.f32 %v2911_v9, %v2859_v33 }
 0x1fa   :  { %v1510_v38 = vsub.f32 %v1494_v46, %v2375_v24  ;;  %v2407_v16 = vpop.f32.mrb[48].mxu1  ;;  %v1424_v17 = vpop.f32.mrb[49].mxu0 }
 0x1fb   :  { %v1902_v39 = vsub.f32 %v1886_v5, %v2407_v16  ;;  %v1508_v14 = vsub.f32 %v1492_v13, %v1424_v17  ;;  %v1816_v26 = vpop.f32.mrb[49].mxu1  ;;  %v2376_v27 = vpop.f32.mrb[50].mxu0  ;;  %v3496_v17 = vsub.f32 %v2911_v9, %v2864_v2 }
 0x1fc   :  { %761 = vadd.xlane.f32.xlu0 %v760_v45  ;;  %v1900_v46 = vsub.f32 %v1884_v50, %v1816_v26  ;;  %v3083_v56 = vsub.f32 %v1495_v20, %v2376_v27  ;;  %v2408_v52 = vpop.f32.mrb[50].mxu1  ;;  %v1427_v5 = vpop.f32.mrb[51].mxu0  ;;  %v1144_v50 = vmul.f32 %v1128_v28, %v1128_v28  ;;  %v1190_v20 = vsel %vm163_vm0, %v1146_v15, 0.0 }
 0x1fd   :  { %764 = vadd.xlane.f32.xlu1 %v763_v59  ;;  %v1903_v13 = vsub.f32 %v1887_v29, %v2408_v52  ;;  %v1509_v53 = vsub.f32 %v1493_v34, %v1427_v5  ;;  %v1819_v8 = vpop.f32.mrb[51].mxu1  ;;  %v1524_v47 = vmul.f32 %v1508_v14, %v1508_v14  ;;  %v1526_v58 = vmul.f32 %v1510_v38, %v1510_v38 }
 0x1fe   :  { %v1901_v49 = vsub.f32 %v1885_v6, %v1819_v8  ;;  %v1184_v19 = vsel %vm163_vm0, %v1144_v50, 0.0  ;;  %v1916_v16 = vmul.f32 %v1900_v46, %v1900_v46  ;;  %v3497_v45 = vsub.f32 %v2914_v10, %v2859_v33 }
 0x1ff   :  { %v1540_v25 = vsel %vm163_vm0, %v1524_v47, 0.0  ;;  %v1525_v42 = vmul.f32 %v1509_v53, %v1509_v53  ;;  %v1546_v62 = vsel %vm163_vm0, %v1526_v58, 0.0  ;;  %v1919_v27 = vmul.f32 %v1903_v13, %v1903_v13 }
 0x200   :  { %1191 = vadd.xlane.f32.xlu0 %v1190_v20  ;;  %v3498_v59 = vsub.f32 %v2914_v10, %v2864_v2  ;;  %v3499_v52 = vsub.f32 %v2917_v11, %v2859_v33  ;;  %v3500_v8 = vsub.f32 %v2917_v11, %v2864_v2  ;;  %v3501_v13 = vsub.f32 %v2920_v12, %v2859_v33 }
 0x201   :  { %1194 = vadd.xlane.f32.xlu1 %v1193_v54  ;;  %v2379_v60 = vpop.f32.mrb[52].mxu0  ;;  %v1543_v21 = vsel %vm163_vm0, %v1525_v42, 0.0  ;;  %v1941_v11 = vsel %vm163_vm0, %v1919_v27, 0.0 }
 0x202   :  { %v3099_v22 = vsub.f32 %v1498_v0, %v2379_v60  ;;  %v2411_v29 = vpop.f32.mrb[52].mxu1  ;;  %v1440_v34 = vpop.f32.mrb[53].mxu0  ;;  %v1187_v0 = vsel %vm163_vm0, %v1145_v41, 0.0  ;;  %v3502_v41 = vsub.f32 %v2920_v12, %v2864_v2  ;;  %v1527_v60 = vmul.f32 %v3083_v56, %v3083_v56 }
 0x203   :  { %v1906_v6 = vsub.f32 %v1890_v1, %v2411_v29  ;;  %v3108_v28 = vsub.f32 %v1496_v3, %v1440_v34  ;;  %v1832_v61 = vpop.f32.mrb[53].mxu1  ;;  %v2380_v35 = vpop.f32.mrb[54].mxu0  ;;  %v1932_v29 = vsel %vm163_vm0, %v1916_v16, 0.0  ;;  %v1917_v34 = vmul.f32 %v1901_v49, %v1901_v49 }
 0x204   :  { %1185 = vadd.xlane.f32.xlu0 %v1184_v19  ;;  %v3114_v57 = vsub.f32 %v1888_v4, %v1832_v61  ;;  %v3119_v51 = vsub.f32 %v1499_v7, %v2380_v35  ;;  %v2412_v1 = vpop.f32.mrb[54].mxu1  ;;  %v1443_v44 = vpop.f32.mrb[55].mxu0  ;;  %v3494_v4 = vsub.f32 %v2892_v63, %v2864_v2  ;;  %v1918_v7 = vmul.f32 %v1902_v39, %v1902_v39 }
 0x205   :  { %1188 = vadd.xlane.f32.xlu1 %v1187_v0  ;;  %v3124_v3 = vsub.f32 %v1891_v23, %v2412_v1  ;;  %v3129_v48 = vsub.f32 %v1497_v18, %v1443_v44  ;;  %v1835_v55 = vpop.f32.mrb[55].mxu1  ;;  %v3503_v19 = vsub.f32 %v2939_v30, %v2859_v33  ;;  %v1922_v58 = vmul.f32 %v1906_v6, %v1906_v6 }
 0x206   :  { %v3134_v43 = vsub.f32 %v3494_v4, %v1835_v55  ;;  %v1938_v63 = vsel %vm163_vm0, %v1918_v7, 0.0  ;;  %v1549_v0 = vsel %vm163_vm0, %v1527_v60, 0.0  ;;  %v3504_v56 = vsub.f32 %v2939_v30, %v2864_v2 }
 0x207   :  { %v3505_v49 = vsub.f32 %v2942_v31, %v2859_v33  ;;  %v1530_v7 = vmul.f32 %v3099_v22, %v3099_v22  ;;  %v3506_v6 = vsub.f32 %v2942_v31, %v2864_v2  ;;  %v3507_v30 = vsub.f32 %v2945_v32, %v2859_v33 }
 0x208   :  { %1541 = vadd.xlane.f32.xlu0 %v1540_v25  ;;  %v1935_v25 = vsel %vm163_vm0, %v1917_v34, 0.0  ;;  %v3509_v22 = vsub.f32 %v2948_v37, %v2859_v33  ;;  %v3510_v31 = vsub.f32 %v2948_v37, %v2864_v2  ;;  %v1531_v33 = vmul.f32 %v3119_v51, %v3119_v51 }
 0x209   :  { %1547 = vadd.xlane.f32.xlu1 %v1546_v62  ;;  %v2383_v23 = vpop.f32.mrb[56].mxu0 }
 0x20a   :  { %v3141_v18 = vsub.f32 %v3495_v40, %v2383_v23  ;;  %v2415_v24 = vpop.f32.mrb[56].mxu1  ;;  %v1456_v38 = vpop.f32.mrb[57].mxu0 }
 0x20b   :  { %v1910_v15 = vsub.f32 %v3496_v17, %v2415_v24  ;;  %v3150_v39 = vsub.f32 %v3497_v45, %v1456_v38  ;;  %v1848_v14 = vpop.f32.mrb[57].mxu1  ;;  %v2384_v26 = vpop.f32.mrb[58].mxu0  ;;  %v3508_v24 = vsub.f32 %v2945_v32, %v2864_v2  ;;  %v1920_v45 = vmul.f32 %v3114_v57, %v3114_v57 }
 0x20c   :  { %1939 = vadd.xlane.f32.xlu0 %v1938_v63  ;;  %v1908_v46 = vsub.f32 %v3498_v59, %v1848_v14  ;;  %v3159_v9 = vsub.f32 %v3499_v52, %v2384_v26  ;;  %v2416_v5 = vpop.f32.mrb[58].mxu1  ;;  %v1459_v53 = vpop.f32.mrb[59].mxu0  ;;  %v1950_v14 = vsel %vm163_vm0, %v1922_v58, 0.0  ;;  %v1528_v26 = vmul.f32 %v3108_v28, %v3108_v28 }
 0x20d   :  { %1544 = vadd.xlane.f32.xlu1 %v1543_v21  ;;  %v3164_v50 = vsub.f32 %v3500_v8, %v2416_v5  ;;  %v3169_v20 = vsub.f32 %v3501_v13, %v1459_v53  ;;  %v1851_v10 = vpop.f32.mrb[59].mxu1  ;;  %v1558_v32 = vsel %vm163_vm0, %v1530_v7, 0.0  ;;  %v1944_v27 = vsel %vm163_vm0, %v1920_v45, 0.0 }
 0x20e   :  { %v3174_v54 = vsub.f32 %v3502_v41, %v1851_v10  ;;  %v1923_v2 = vmul.f32 %v3124_v3, %v3124_v3  ;;  %v1552_v37 = vsel %vm163_vm0, %v1528_v26, 0.0  ;;  %v1529_v57 = vmul.f32 %v3129_v48, %v3129_v48 }
 0x20f   :  { %v1561_v28 = vsel %vm163_vm0, %v1531_v33, 0.0  ;;  %v1921_v21 = vmul.f32 %v3134_v43, %v3134_v43  ;;  %v1926_v59 = vmul.f32 %v1910_v15, %v1910_v15  ;;  %v1534_v3 = vmul.f32 %v3141_v18, %v3141_v18 }
 0x210   :  { %1933 = vadd.xlane.f32.xlu0 %v1932_v29  ;;  %v1953_v51 = vsel %vm163_vm0, %v1923_v2, 0.0  ;;  %v1555_v52 = vsel %vm163_vm0, %v1529_v57, 0.0  ;;  %v1924_v48 = vmul.f32 %v1908_v46, %v1908_v46  ;;  %v1532_v43 = vmul.f32 %v3150_v39, %v3150_v39 }
 0x211   :  { %1942 = vadd.xlane.f32.xlu1 %v1941_v11  ;;  %v2387_v47 = vpop.f32.mrb[60].mxu0  ;;  %v1947_v5 = vsel %vm163_vm0, %v1921_v21, 0.0  ;;  %v1962_v53 = vsel %vm163_vm0, %v1926_v59, 0.0  ;;  %v1570_v8 = vsel %vm163_vm0, %v1534_v3, 0.0  ;;  %v1535_v15 = vmul.f32 %v3159_v9, %v3159_v9 }
 0x212   :  { %v3183_v61 = vsub.f32 %v3503_v19, %v2387_v47  ;;  %v2419_v35 = vpop.f32.mrb[60].mxu1  ;;  %v1472_v12 = vpop.f32.mrb[61].mxu0  ;;  %v1956_v13 = vsel %vm163_vm0, %v1924_v48, 0.0  ;;  %v1927_v18 = vmul.f32 %v3164_v50, %v3164_v50  ;;  %v1564_v46 = vsel %vm163_vm0, %v1532_v43, 0.0 }
 0x213   :  { %v1914_v1 = vsub.f32 %v3504_v56, %v2419_v35  ;;  %v3192_v44 = vsub.f32 %v3505_v49, %v1472_v12  ;;  %v1864_v55 = vpop.f32.mrb[61].mxu1  ;;  %v2388_v4 = vpop.f32.mrb[62].mxu0  ;;  %v1533_v10 = vmul.f32 %v3169_v20, %v3169_v20  ;;  %v1573_v39 = vsel %vm163_vm0, %v1535_v15, 0.0 }
 0x214   :  { %1550 = vadd.xlane.f32.xlu0 %v1549_v0  ;;  %v1912_v42 = vsub.f32 %v3506_v6, %v1864_v55  ;;  %v3203_v62 = vsub.f32 %v3507_v30, %v2388_v4  ;;  %v2420_v23 = vpop.f32.mrb[62].mxu1  ;;  %v1475_v40 = vpop.f32.mrb[63].mxu0  ;;  %v1925_v41 = vmul.f32 %v3174_v54, %v3174_v54  ;;  %v1965_v9 = vsel %vm163_vm0, %v1927_v18, 0.0 }
 0x215   :  { %1936 = vadd.xlane.f32.xlu1 %v1935_v25  ;;  %v3208_v38 = vsub.f32 %v3508_v24, %v2420_v23  ;;  %v1521_v16 = vsub.f32 %v3509_v22, %v1475_v40  ;;  %v1867_v63 = vpop.f32.mrb[63].mxu1  ;;  %v1930_v60 = vmul.f32 %v1914_v1, %v1914_v1  ;;  %v1567_v29 = vsel %vm163_vm0, %v1533_v10, 0.0 }
 0x216   :  { %v1913_v17 = vsub.f32 %v3510_v31, %v1867_v63  ;;  %v1538_v50 = vmul.f32 %v3183_v61, %v3183_v61  ;;  %v1959_v34 = vsel %vm163_vm0, %v1925_v41, 0.0  ;;  %v1928_v20 = vmul.f32 %v1912_v42, %v1912_v42 }
 0x217   :  { %v1974_v11 = vsel %vm163_vm0, %v1930_v60, 0.0  ;;  %v1536_v54 = vmul.f32 %v3192_v44, %v3192_v44  ;;  %v1537_v19 = vmul.f32 %v1521_v16, %v1521_v16  ;;  %v1539_v58 = vmul.f32 %v3203_v62, %v3203_v62 }
 0x218   :  { %1951 = vadd.xlane.f32.xlu0 %v1950_v14  ;;  %v1582_v47 = vsel %vm163_vm0, %v1538_v50, 0.0  ;;  %v1968_v35 = vsel %vm163_vm0, %v1928_v20, 0.0  ;;  %v1929_v12 = vmul.f32 %v1913_v17, %v1913_v17  ;;  %v1931_v56 = vmul.f32 %v3208_v38, %v3208_v38 }
 0x219   :  { %1559 = vadd.xlane.f32.xlu1 %v1558_v32  ;;  %v1576_v61 = vsel %vm163_vm0, %v1536_v54, 0.0  ;;  %v1579_v0 = vsel %vm163_vm0, %v1537_v19, 0.0  ;;  %v1585_v49 = vsel %vm163_vm0, %v1539_v58, 0.0  ;;  %v3511_v40 = vlaneseq }
 0x21a   :  { %v1971_v1 = vsel %vm163_vm0, %v1929_v12, 0.0  ;;  %v1977_v44 = vsel %vm163_vm0, %v1931_v56, 0.0 }
 0x21b   :  { %v3273_v24 = vand.u32 127, %v3511_v40 }
 0x21c   :  { %1945 = vadd.xlane.f32.xlu0 %v1944_v27 }
 0x21d   :  { %1553 = vadd.xlane.f32.xlu1 %v1552_v37  ;;  %v826_v22 = vadd.s32 4294967288, %v3273_v24  ;;  %v833_v31 = vadd.s32 4294967280, %v3273_v24  ;;  %v840_v14 = vadd.s32 4294967272, %v3273_v24  ;;  %v3290_v37 = vsub.s32 %v3273_v24, %v2686_v36 }
 0x21e   :  { %v868_v59 = vadd.s32 4294967240, %v3273_v24  ;;  %v854_v15 = vadd.s32 4294967256, %v3273_v24 }
 0x21f   :  { %v3281_v26 = vsub.s32 %v826_v22, %v2686_v36  ;;  %v3286_v2 = vsub.s32 %v833_v31, %v2686_v36 }
 0x220   :  { %1562 = vadd.xlane.f32.xlu0 %v1561_v28  ;;  %v3315_v19 = vsub.s32 %v854_v15, %v2686_v36 }
 0x221   :  { %1954 = vadd.xlane.f32.xlu1 %v1953_v51  ;;  %v861_v51 = vadd.s32 4294967248, %v3273_v24 }
 0x223   :  { %v3304_v41 = vsub.s32 %v861_v51, %v2686_v36 }
 0x224   :  { %1556 = vadd.xlane.f32.xlu0 %v1555_v52  ;;  %v847_v52 = vadd.s32 4294967264, %v3273_v24 }
 0x225   :  { %1948 = vadd.xlane.f32.xlu1 %v1947_v5  ;;  %v3298_v5 = vsub.s32 %v840_v14, %v2686_v36 }
 0x226   :  { %v3310_v60 = vsub.s32 %v847_v52, %v2686_v36 }
 0x228   :  { %1963 = vadd.xlane.f32.xlu0 %v1962_v53 }
 0x229   :  { %1571 = vadd.xlane.f32.xlu1 %v1570_v8 }
 0x22c   :  { %1957 = vadd.xlane.f32.xlu0 %v1956_v13 }
 0x22d   :  { %1565 = vadd.xlane.f32.xlu1 %v1564_v46 }
 0x230   :  { %1574 = vadd.xlane.f32.xlu0 %v1573_v39 }
 0x231   :  { %1966 = vadd.xlane.f32.xlu1 %v1965_v9  ;;  %v3307_v9 = vsub.s32 %v868_v59, %v2686_v36 }
 0x234   :  { %1568 = vadd.xlane.f32.xlu0 %v1567_v29 }
 0x235   :  { %1960 = vadd.xlane.f32.xlu1 %v1959_v34 }
 0x238   :  { %1975 = vadd.xlane.f32.xlu0 %v1974_v11 }
 0x239   :  { %1583 = vadd.xlane.f32.xlu1 %v1582_v47 }
 0x23c   :  { %1969 = vadd.xlane.f32.xlu0 %v1968_v35 }
 0x23d   :  { %1577 = vadd.xlane.f32.xlu1 %v1576_v61 }
 0x240   :  { %1580 = vadd.xlane.f32.xlu0 %v1579_v0 }
 0x241   :  { %1972 = vadd.xlane.f32.xlu1 %v1971_v1 }
 0x244   :  { %1586 = vadd.xlane.f32.xlu0 %v1585_v49 }
 0x245   :  { %1978 = vadd.xlane.f32.xlu1 %v1977_v44 }
 0x254   :  { %v732_v55 = vpop.xlane.xlu1 %731 }
 0x255   :  { %v726_v4 = vpop.xlane.xlu0 %725  ;;  %v774_v33 = vmul.f32 0.03125, %v732_v55 }
 0x256   :  { %v772_v17 = vmul.f32 0.03125, %v726_v4  ;;  %v889_v4 = vadd.s32 4294967216, %v3273_v24 }
 0x257   :  { %v790_v43 = vsub.f32 0.0, %v774_v33  ;;  %v882_v33 = vadd.s32 4294967224, %v3273_v24 }
 0x258   :  { %v735_v7 = vpop.xlane.xlu1 %734  ;;  %v788_v57 = vsub.f32 0.0, %v772_v17 }
 0x259   :  { %v1156_v25 = vpop.xlane.xlu0 %1155  ;;  %v775_v48 = vmul.f32 0.03125, %v735_v7  ;;  %v837_v11 = vrot.slane %v790_v43, %v3286_v2  ;;  %v896_v7 = vadd.s32 4294967208, %v3273_v24 }
 0x25a   :  { %v825_v18 = vrot.slane %v788_v57, %v3290_v37  ;;  %v1198_v34 = vmul.f32 0.03125, %v1156_v25 }
 0x25b   :  { %v791_v50 = vsub.f32 0.0, %v775_v48 }
 0x25c   :  { %v1159_v6 = vpop.xlane.xlu1 %1158  ;;  %v1214_v55 = vsub.f32 0.0, %v1198_v34 }
 0x25d   :  { %v1150_v42 = vpop.xlane.xlu0 %1149  ;;  %v1199_v54 = vmul.f32 0.03125, %v1159_v6  ;;  %v844_v44 = vrot.slane %v791_v50, %v3298_v5 }
 0x25e   :  { %v1196_v8 = vmul.f32 0.03125, %v1150_v42 }
 0x25f   :  { %v1215_v25 = vsub.f32 0.0, %v1199_v54 }
 0x260   :  { %v1153_v62 = vpop.xlane.xlu1 %1152  ;;  %v1212_v47 = vsub.f32 0.0, %v1196_v8 }
 0x261   :  { %v729_v30 = vpop.xlane.xlu0 %728  ;;  %v1197_v28 = vmul.f32 0.03125, %v1153_v62  ;;  %v1261_v15 = vrot.slane %v1215_v25, %v3298_v5 }
 0x262   :  { %v773_v16 = vmul.f32 0.03125, %v729_v30  ;;  %v1247_v6 = vrot.slane %v1212_v47, %v3290_v37  ;;  %v875_v30 = vadd.s32 4294967232, %v3273_v24 }
 0x263   :  { %v1213_v46 = vsub.f32 0.0, %v1197_v28  ;;  %v3336_v28 = vsub.s32 %v896_v7, %v2686_v36 }
 0x264   :  { %v789_v32 = vsub.f32 0.0, %v773_v16  ;;  %v3339_v51 = vsub.s32 %v875_v30, %v2686_v36 }
 0x265   :  { %v744_v23 = vpop.xlane.xlu0 %743  ;;  %v1251_v12 = vrot.slane %v1213_v46, %v3281_v26 }
 0x266   :  { %v3275_v38 = vpop.xlane.xlu1 %746  ;;  %v830_v53 = vrot.slane %v789_v32, %v3281_v26  ;;  %v778_v56 = vmul.f32 0.03125, %v744_v23  ;;  %v1256_v32 = vrot.slane %v1214_v55, %v3286_v2  ;;  %v903_v55 = vadd.s32 4294967200, %v3273_v24 }
 0x267   :  { %v779_v42 = vmul.f32 0.03125, %v3275_v38  ;;  %v1252_v31 = vsel %vm831_vm1, %v1251_v12, %v1247_v6  ;;  %v3332_v38 = vsub.s32 %v889_v4, %v2686_v36 }
 0x268   :  { %v832_v20 = vsel %vm831_vm1, %v830_v53, %v825_v18  ;;  %v794_v17 = vsub.f32 0.0, %v778_v56 }
 0x269   :  { %v738_v63 = vpop.xlane.xlu0 %737  ;;  %v839_v0 = vsel %vm838_vm2, %v837_v11, %v832_v20  ;;  %v795_v57 = vsub.f32 0.0, %v779_v42 }
 0x26a   :  { %v741_v45 = vpop.xlane.xlu1 %740  ;;  %v776_v3 = vmul.f32 0.03125, %v738_v63  ;;  %v846_v23 = vsel %vm845_vm3, %v844_v44, %v839_v0  ;;  %v924_v44 = vadd.s32 4294967176, %v3273_v24 }
 0x26b   :  { %v777_v10 = vmul.f32 0.03125, %v741_v45 }
 0x26c   :  { %v792_v29 = vsub.f32 0.0, %v776_v3  ;;  %v1257_v3 = vsel %vm838_vm2, %v1256_v32, %v1252_v31  ;;  %v3370_v31 = vsub.s32 %v924_v44, %v2686_v36 }
 0x26d   :  { %v3283_v27 = vpop.xlane.xlu0 %1167  ;;  %v793_v61 = vsub.f32 0.0, %v777_v10  ;;  %v3348_v10 = vsub.s32 %v882_v33, %v2686_v36  ;;  %v1262_v34 = vsel %vm845_vm3, %v1261_v15, %v1257_v3 }
 0x26e   :  { %v3292_v21 = vpop.xlane.xlu1 %1170  ;;  %v851_v1 = vrot.slane %v792_v29, %v3310_v60  ;;  %v1202_v18 = vmul.f32 0.03125, %v3283_v27  ;;  %v872_v29 = vrot.slane %v795_v57, %v3307_v9 }
 0x26f   :  { %v858_v40 = vrot.slane %v793_v61, %v3315_v19  ;;  %v1203_v56 = vmul.f32 0.03125, %v3292_v21 }
 0x270   :  { %v853_v45 = vsel %vm852_vm4, %v851_v1, %v846_v23  ;;  %v1218_v0 = vsub.f32 0.0, %v1202_v18 }
 0x271   :  { %v1162_v13 = vpop.xlane.xlu0 %1161  ;;  %v860_v48 = vsel %vm859_vm5, %v858_v40, %v853_v45  ;;  %v1219_v40 = vsub.f32 0.0, %v1203_v56 }
 0x272   :  { %v1165_v39 = vpop.xlane.xlu1 %1164  ;;  %v1200_v49 = vmul.f32 0.03125, %v1162_v13  ;;  %v865_v13 = vrot.slane %v794_v17, %v3304_v41  ;;  %v1276_v23 = vrot.slane %v1218_v0, %v3304_v41  ;;  %v3373_v17 = vsub.s32 %v903_v55, %v2686_v36 }
 0x273   :  { %v1201_v22 = vmul.f32 0.03125, %v1165_v39  ;;  %v917_v39 = vadd.s32 4294967184, %v3273_v24 }
 0x274   :  { %v1216_v14 = vsub.f32 0.0, %v1200_v49  ;;  %v867_v50 = vsel %vm866_vm6, %v865_v13, %v860_v48 }
 0x275   :  { %v756_v35 = vpop.xlane.xlu0 %755  ;;  %v1217_v53 = vsub.f32 0.0, %v1201_v22  ;;  %v874_v4 = vsel %vm873_vm7, %v872_v29, %v867_v50  ;;  %v3363_v25 = vsub.s32 %v917_v39, %v2686_v36 }
 0x276   :  { %v759_v58 = vpop.xlane.xlu1 %758  ;;  %v1266_v46 = vrot.slane %v1216_v14, %v3310_v60  ;;  %v782_v27 = vmul.f32 0.03125, %v756_v35 }
 0x277   :  { %v1271_v54 = vrot.slane %v1217_v53, %v3315_v19  ;;  %v783_v49 = vmul.f32 0.03125, %v759_v58 }
 0x278   :  { %v1267_v1 = vsel %vm852_vm4, %v1266_v46, %v1262_v34  ;;  %v798_v42 = vsub.f32 0.0, %v782_v27 }
 0x279   :  { %v750_v62 = vpop.xlane.xlu0 %749  ;;  %v1272_v21 = vsel %vm859_vm5, %v1271_v54, %v1267_v1  ;;  %v799_v22 = vsub.f32 0.0, %v783_v49 }
 0x27a   :  { %v780_v16 = vmul.f32 0.03125, %v750_v62  ;;  %v753_v63 = vpop.xlane.xlu1 %752  ;;  %v1277_v45 = vsel %vm866_vm6, %v1276_v23, %v1272_v21 }
 0x27b   :  { %v781_v59 = vmul.f32 0.03125, %v753_v63  ;;  %v900_v15 = vrot.slane %v799_v22, %v3336_v28 }
 0x27c   :  { %v796_v43 = vsub.f32 0.0, %v780_v16  ;;  %v910_v16 = vadd.s32 4294967192, %v3273_v24 }
 0x27d   :  { %v1180_v52 = vpop.xlane.xlu0 %1179  ;;  %v797_v20 = vsub.f32 0.0, %v781_v59  ;;  %v893_v59 = vrot.slane %v798_v42, %v3332_v38 }
 0x27e   :  { %v1183_v8 = vpop.xlane.xlu1 %1182  ;;  %v879_v47 = vrot.slane %v796_v43, %v3339_v51  ;;  %v1206_v3 = vmul.f32 0.03125, %v1180_v52  ;;  %v1281_v43 = vrot.slane %v1219_v40, %v3307_v9  ;;  %v3382_v13 = vsub.s32 %v910_v16, %v2686_v36 }
 0x27f   :  { %v886_v35 = vrot.slane %v797_v20, %v3348_v10  ;;  %v1207_v39 = vmul.f32 0.03125, %v1183_v8 }
 0x280   :  { %v881_v58 = vsel %vm880_vm8, %v879_v47, %v874_v4  ;;  %v1282_v34 = vsel %vm873_vm7, %v1281_v43, %v1277_v45  ;;  %v1222_v27 = vsub.f32 0.0, %v1206_v3 }
 0x281   :  { %v1174_v11 = vpop.xlane.xlu0 %1173  ;;  %v888_v14 = vsel %vm887_vm9, %v886_v35, %v881_v58  ;;  %v1223_v0 = vsub.f32 0.0, %v1207_v39 }
 0x282   :  { %v1204_v12 = vmul.f32 0.03125, %v1174_v11  ;;  %v1177_v61 = vpop.xlane.xlu1 %1176  ;;  %v895_v46 = vsel %vm894_vm10, %v893_v59, %v888_v14 }
 0x283   :  { %v1205_v7 = vmul.f32 0.03125, %v1177_v61  ;;  %v902_v61 = vsel %vm901_vm11, %v900_v15, %v895_v46  ;;  %v1301_v16 = vrot.slane %v1223_v0, %v3336_v28 }
 0x284   :  { %v1220_v30 = vsub.f32 0.0, %v1204_v12 }
 0x285   :  { %v768_v6 = vpop.xlane.xlu0 %767  ;;  %v1221_v32 = vsub.f32 0.0, %v1205_v7 }
 0x286   :  { %v771_v62 = vpop.xlane.xlu1 %770  ;;  %v786_v63 = vmul.f32 0.03125, %v768_v6  ;;  %v1286_v24 = vrot.slane %v1220_v30, %v3339_v51  ;;  %v1296_v6 = vrot.slane %v1222_v27, %v3332_v38 }
 0x287   :  { %v787_v33 = vmul.f32 0.03125, %v771_v62  ;;  %v1291_v52 = vrot.slane %v1221_v32, %v3348_v10 }
 0x288   :  { %v802_v29 = vsub.f32 0.0, %v786_v63  ;;  %v1287_v47 = vsel %vm880_vm8, %v1286_v24, %v1282_v34 }
 0x289   :  { %v762_v57 = vpop.xlane.xlu0 %761  ;;  %v803_v20 = vsub.f32 0.0, %v787_v33  ;;  %v1292_v44 = vsel %vm887_vm9, %v1291_v52, %v1287_v47 }
 0x28a   :  { %v784_v48 = vmul.f32 0.03125, %v762_v57  ;;  %v765_v53 = vpop.xlane.xlu1 %764  ;;  %v921_v56 = vrot.slane %v802_v29, %v3363_v25  ;;  %v1297_v23 = vsel %vm894_vm10, %v1296_v6, %v1292_v44 }
 0x28b   :  { %v785_v18 = vmul.f32 0.03125, %v765_v53  ;;  %v928_v55 = vrot.slane %v803_v20, %v3370_v31  ;;  %v1302_v57 = vsel %vm901_vm11, %v1301_v16, %v1297_v23 }
 0x28c   :  { %v800_v50 = vsub.f32 0.0, %v784_v48 }
 0x28d   :  { %v801_v11 = vsub.f32 0.0, %v785_v18  ;;  %v1192_v54 = vpop.xlane.xlu0 %1191 }
 0x28e   :  { %v907_v12 = vrot.slane %v800_v50, %v3373_v17  ;;  %v1195_v36 = vpop.xlane.xlu1 %1194  ;;  %v1210_v49 = vmul.f32 0.03125, %v1192_v54 }
 0x28f   :  { %v914_v8 = vrot.slane %v801_v11, %v3382_v13  ;;  %v1211_v35 = vmul.f32 0.03125, %v1195_v36 }
 0x290   :  { %v909_v1 = vsel %vm908_vm12, %v907_v12, %v902_v61  ;;  %v1226_v40 = vsub.f32 0.0, %v1210_v49 }
 0x291   :  { %v916_v4 = vsel %vm915_vm13, %v914_v8, %v909_v1  ;;  %v1186_v7 = vpop.xlane.xlu0 %1185  ;;  %v1227_v63 = vsub.f32 0.0, %v1211_v35 }
 0x292   :  { %v923_v21 = vsel %vm922_vm14, %v921_v56, %v916_v4  ;;  %v1208_v42 = vmul.f32 0.03125, %v1186_v7  ;;  %v1189_v58 = vpop.xlane.xlu1 %1188  ;;  %v1316_v3 = vrot.slane %v1226_v40, %v3363_v25 }
 0x293   :  { %v1209_v30 = vmul.f32 0.03125, %v1189_v58  ;;  %v930_v62 = vsel %vm929_vm15, %v928_v55, %v923_v21  ;;  %v1321_v48 = vrot.slane %v1227_v63, %v3370_v31 }
 0x294   :  { %v1224_v22 = vsub.f32 0.0, %v1208_v42  ;;  %932 = vst [vmem:[%s3492_s5] sm:$0x1] %v930_v62 }
 0x295   :  { %v1225_v45 = vsub.f32 0.0, %v1209_v30  ;;  %v1542_v14 = vpop.xlane.xlu0 %1541 }
 0x296   :  { %v1306_v32 = vrot.slane %v1224_v22, %v3373_v17  ;;  %v1548_v33 = vpop.xlane.xlu1 %1547  ;;  %v1588_v61 = vmul.f32 0.03125, %v1542_v14 }
 0x297   :  { %v1311_v59 = vrot.slane %v1225_v45, %v3382_v13  ;;  %v1590_v1 = vmul.f32 0.03125, %v1548_v33 }
 0x298   :  { %v1307_v24 = vsel %vm908_vm12, %v1306_v32, %v1302_v57  ;;  %v1604_v55 = vsub.f32 0.0, %v1588_v61 }
 0x299   :  { %v1312_v53 = vsel %vm915_vm13, %v1311_v59, %v1307_v24  ;;  %v1940_v43 = vpop.xlane.xlu0 %1939  ;;  %v1606_v42 = vsub.f32 0.0, %v1590_v1 }
 0x29a   :  { %v1317_v15 = vsel %vm922_vm14, %v1316_v3, %v1312_v53  ;;  %v1545_v18 = vpop.xlane.xlu1 %1544  ;;  %v1982_v4 = vmul.f32 0.03125, %v1940_v43  ;;  %v1639_v16 = vrot.slane %v1604_v55, %v3290_v37 }
 0x29b   :  { %v1322_v46 = vsel %vm929_vm15, %v1321_v48, %v1317_v15  ;;  %v1589_v12 = vmul.f32 0.03125, %v1545_v18  ;;  %v1648_v59 = vrot.slane %v1606_v42, %v3286_v2 }
 0x29c   :  { %1324 = vst [vmem:[%s3492_s5 + $0x1] sm:$0x1] %v1322_v46  ;;  %v1998_v63 = vsub.f32 0.0, %v1982_v4 }
 0x29d   :  { %v1934_v39 = vpop.xlane.xlu0 %1933  ;;  %v1605_v49 = vsub.f32 0.0, %v1589_v12 }
 0x29e   :  { %v1943_v29 = vpop.xlane.xlu1 %1942  ;;  %v1980_v0 = vmul.f32 0.03125, %v1934_v39  ;;  %v2040_v15 = vrot.slane %v1998_v63, %v3286_v2 }
 0x29f   :  { %v1643_v58 = vrot.slane %v1605_v49, %v3281_v26  ;;  %v1983_v62 = vmul.f32 0.03125, %v1943_v29 }
 0x2a0   :  { %v1996_v6 = vsub.f32 0.0, %v1980_v0 }
 0x2a1   :  { %v1551_v50 = vpop.xlane.xlu0 %1550  ;;  %v1644_v3 = vsel %vm831_vm1, %v1643_v58, %v1639_v16  ;;  %v1999_v48 = vsub.f32 0.0, %v1983_v62 }
 0x2a2   :  { %v1937_v34 = vpop.xlane.xlu1 %1936  ;;  %v1591_v35 = vmul.f32 0.03125, %v1551_v50  ;;  %v2031_v33 = vrot.slane %v1996_v6, %v3290_v37 }
 0x2a3   :  { %v1981_v36 = vmul.f32 0.03125, %v1937_v34  ;;  %v2045_v61 = vrot.slane %v1999_v48, %v3298_v5 }
 0x2a4   :  { %v1607_v45 = vsub.f32 0.0, %v1591_v35 }
 0x2a5   :  { %v1952_v52 = vpop.xlane.xlu0 %1951  ;;  %v1997_v44 = vsub.f32 0.0, %v1981_v36 }
 0x2a6   :  { %v1560_v20 = vpop.xlane.xlu1 %1559  ;;  %v1653_v18 = vrot.slane %v1607_v45, %v3298_v5  ;;  %v1986_v50 = vmul.f32 0.03125, %v1952_v52 }
 0x2a7   :  { %v2035_v23 = vrot.slane %v1997_v44, %v3281_v26  ;;  %v1594_v46 = vmul.f32 0.03125, %v1560_v20 }
 0x2a8   :  { %v2002_v49 = vsub.f32 0.0, %v1986_v50 }
 0x2a9   :  { %v1946_v11 = vpop.xlane.xlu0 %1945  ;;  %v2036_v53 = vsel %vm831_vm1, %v2035_v23, %v2031_v33 }
 0x2aa   :  { %v1554_v54 = vpop.xlane.xlu1 %1553  ;;  %v1984_v40 = vmul.f32 0.03125, %v1946_v11  ;;  %v1649_v11 = vsel %vm838_vm2, %v1648_v59, %v1644_v3  ;;  %v2060_v63 = vrot.slane %v2002_v49, %v3304_v41 }
 0x2ab   :  { %v1592_v30 = vmul.f32 0.03125, %v1554_v54  ;;  %v2041_v54 = vsel %vm838_vm2, %v2040_v15, %v2036_v53  ;;  %v1654_v20 = vsel %vm845_vm3, %v1653_v18, %v1649_v11 }
 0x2ac   :  { %v2000_v26 = vsub.f32 0.0, %v1984_v40  ;;  %v2046_v44 = vsel %vm845_vm3, %v2045_v61, %v2041_v54 }
 0x2ad   :  { %v1563_v27 = vpop.xlane.xlu0 %1562  ;;  %v1608_v24 = vsub.f32 0.0, %v1592_v30 }
 0x2ae   :  { %v1955_v47 = vpop.xlane.xlu1 %1954  ;;  %v1595_v37 = vmul.f32 0.03125, %v1563_v27 }
 0x2af   :  { %v1658_v12 = vrot.slane %v1608_v24, %v3310_v60  ;;  %v1987_v52 = vmul.f32 0.03125, %v1955_v47 }
 0x2b0   :  { %v1611_v55 = vsub.f32 0.0, %v1595_v37 }
 0x2b1   :  { %v1557_v8 = vpop.xlane.xlu0 %1556  ;;  %v1659_v5 = vsel %vm852_vm4, %v1658_v12, %v1654_v20  ;;  %v2003_v23 = vsub.f32 0.0, %v1987_v52 }
 0x2b2   :  { %v1949_v56 = vpop.xlane.xlu1 %1948  ;;  %v1593_v22 = vmul.f32 0.03125, %v1557_v8  ;;  %v2050_v8 = vrot.slane %v2000_v26, %v3310_v60 }
 0x2b3   :  { %v1985_v14 = vmul.f32 0.03125, %v1949_v56  ;;  %v1610_v56 = vsub.f32 0.0, %v1594_v46  ;;  %v2065_v53 = vrot.slane %v2003_v23, %v3307_v9 }
 0x2b4   :  { %v1609_v43 = vsub.f32 0.0, %v1593_v22  ;;  %v2051_v58 = vsel %vm852_vm4, %v2050_v8, %v2046_v44 }
 0x2b5   :  { %v3416_v7 = vpop.xlane.xlu0 %1963  ;;  %v2001_v39 = vsub.f32 0.0, %v1985_v14  ;;  %v1673_v14 = vrot.slane %v1611_v55, %v3307_v9 }
 0x2b6   :  { %v1572_v21 = vpop.xlane.xlu1 %1571  ;;  %v1663_v2 = vrot.slane %v1609_v43, %v3315_v19  ;;  %v1990_v45 = vmul.f32 0.03125, %v3416_v7 }
 0x2b7   :  { %v2055_v27 = vrot.slane %v2001_v39, %v3315_v19  ;;  %v1598_v6 = vmul.f32 0.03125, %v1572_v21  ;;  %v1668_v19 = vrot.slane %v1610_v56, %v3304_v41 }
 0x2b8   :  { %v1664_v30 = vsel %vm859_vm5, %v1663_v2, %v1659_v5  ;;  %v2006_v43 = vsub.f32 0.0, %v1990_v45 }
 0x2b9   :  { %v1958_v32 = vpop.xlane.xlu0 %1957  ;;  %v2056_v40 = vsel %vm859_vm5, %v2055_v27, %v2051_v58  ;;  %v1614_v33 = vsub.f32 0.0, %v1598_v6 }
 0x2ba   :  { %v1566_v57 = vpop.xlane.xlu1 %1565  ;;  %v1988_v0 = vmul.f32 0.03125, %v1958_v32  ;;  %v1669_v32 = vsel %vm866_vm6, %v1668_v19, %v1664_v30  ;;  %v2061_v59 = vsel %vm866_vm6, %v2060_v63, %v2056_v40  ;;  %v2080_v8 = vrot.slane %v2006_v43, %v3332_v38 }
 0x2bb   :  { %v1596_v36 = vmul.f32 0.03125, %v1566_v57  ;;  %v1674_v15 = vsel %vm873_vm7, %v1673_v14, %v1669_v32  ;;  %v1688_v39 = vrot.slane %v1614_v33, %v3332_v38  ;;  %v2066_v50 = vsel %vm873_vm7, %v2065_v53, %v2061_v59 }
 0x2bc   :  { %v2004_v62 = vsub.f32 0.0, %v1988_v0 }
 0x2bd   :  { %v1575_v29 = vpop.xlane.xlu0 %1574  ;;  %v1612_v60 = vsub.f32 0.0, %v1596_v36 }
 0x2be   :  { %v1967_v34 = vpop.xlane.xlu1 %1966  ;;  %v2070_v3 = vrot.slane %v2004_v62, %v3339_v51  ;;  %v1599_v24 = vmul.f32 0.03125, %v1575_v29 }
 0x2bf   :  { %v1678_v57 = vrot.slane %v1612_v60, %v3339_v51  ;;  %v1991_v41 = vmul.f32 0.03125, %v1967_v34 }
 0x2c0   :  { %v2071_v37 = vsel %vm880_vm8, %v2070_v3, %v2066_v50  ;;  %v1615_v11 = vsub.f32 0.0, %v1599_v24 }
 0x2c1   :  { %v1569_v1 = vpop.xlane.xlu0 %1568  ;;  %v1679_v51 = vsel %vm880_vm8, %v1678_v57, %v1674_v15 }
 0x2c2   :  { %v1597_v4 = vmul.f32 0.03125, %v1569_v1  ;;  %v1961_v35 = vpop.xlane.xlu1 %1960  ;;  %v1693_v1 = vrot.slane %v1615_v11, %v3336_v28 }
 0x2c3   :  { %v1989_v42 = vmul.f32 0.03125, %v1961_v35 }
 0x2c4   :  { %v1613_v47 = vsub.f32 0.0, %v1597_v4 }
 0x2c5   :  { %v2005_v22 = vsub.f32 0.0, %v1989_v42  ;;  %v1976_v16 = vpop.xlane.xlu0 %1975 }
 0x2c6   :  { %v1584_v21 = vpop.xlane.xlu1 %1583  ;;  %v1683_v48 = vrot.slane %v1613_v47, %v3348_v10  ;;  %v1994_v2 = vmul.f32 0.03125, %v1976_v16 }
 0x2c7   :  { %v2075_v7 = vrot.slane %v2005_v22, %v3348_v10  ;;  %v2007_v10 = vsub.f32 0.0, %v1991_v41  ;;  %v1602_v12 = vmul.f32 0.03125, %v1584_v21 }
 0x2c8   :  { %v1684_v9 = vsel %vm887_vm9, %v1683_v48, %v1679_v51  ;;  %v2010_v6 = vsub.f32 0.0, %v1994_v2 }
 0x2c9   :  { %v1970_v26 = vpop.xlane.xlu0 %1969  ;;  %v2076_v54 = vsel %vm887_vm9, %v2075_v7, %v2071_v37  ;;  %v1689_v56 = vsel %vm894_vm10, %v1688_v39, %v1684_v9  ;;  %v2085_v4 = vrot.slane %v2007_v10, %v3336_v28  ;;  %v1618_v35 = vsub.f32 0.0, %v1602_v12 }
 0x2ca   :  { %v1992_v18 = vmul.f32 0.03125, %v1970_v26  ;;  %v1578_v46 = vpop.xlane.xlu1 %1577  ;;  %v2081_v49 = vsel %vm894_vm10, %v2080_v8, %v2076_v54  ;;  %v1694_v60 = vsel %vm901_vm11, %v1693_v1, %v1689_v56  ;;  %v2100_v45 = vrot.slane %v2010_v6, %v3363_v25 }
 0x2cb   :  { %v1600_v29 = vmul.f32 0.03125, %v1578_v46  ;;  %v2086_v62 = vsel %vm901_vm11, %v2085_v4, %v2081_v49  ;;  %v1708_v22 = vrot.slane %v1618_v35, %v3363_v25 }
 0x2cc   :  { %v2008_v34 = vsub.f32 0.0, %v1992_v18 }
 0x2cd   :  { %v1616_v36 = vsub.f32 0.0, %v1600_v29  ;;  %v1581_v61 = vpop.xlane.xlu0 %1580 }
 0x2ce   :  { %v1601_v0 = vmul.f32 0.03125, %v1581_v61  ;;  %v1973_v20 = vpop.xlane.xlu1 %1972  ;;  %v2090_v44 = vrot.slane %v2008_v34, %v3373_v17 }
 0x2cf   :  { %v1698_v52 = vrot.slane %v1616_v36, %v3373_v17  ;;  %v1993_v27 = vmul.f32 0.03125, %v1973_v20 }
 0x2d0   :  { %v1617_v55 = vsub.f32 0.0, %v1601_v0  ;;  %v2091_v23 = vsel %vm908_vm12, %v2090_v44, %v2086_v62 }
 0x2d1   :  { %v2009_v5 = vsub.f32 0.0, %v1993_v27  ;;  %v1587_v38 = vpop.xlane.xlu0 %1586  ;;  %v1699_v47 = vsel %vm908_vm12, %v1698_v52, %v1694_v60 }
 0x2d2   :  { %v1703_v42 = vrot.slane %v1617_v55, %v3382_v13  ;;  %v1603_v58 = vmul.f32 0.03125, %v1587_v38  ;;  %v1979_v30 = vpop.xlane.xlu1 %1978 }
 0x2d3   :  { %v2095_v19 = vrot.slane %v2009_v5, %v3382_v13  ;;  %v1995_v17 = vmul.f32 0.03125, %v1979_v30 }
 0x2d4   :  { %v1704_v28 = vsel %vm915_vm13, %v1703_v42, %v1699_v47  ;;  %v1619_v40 = vsub.f32 0.0, %v1603_v58 }
 0x2d5   :  { %v2096_v16 = vsel %vm915_vm13, %v2095_v19, %v2091_v23  ;;  %v2011_v63 = vsub.f32 0.0, %v1995_v17  ;;  %v1709_v14 = vsel %vm922_vm14, %v1708_v22, %v1704_v28 }
 0x2d6   :  { %v1713_v21 = vrot.slane %v1619_v40, %v3370_v31  ;;  %v2101_v33 = vsel %vm922_vm14, %v2100_v45, %v2096_v16 }
 0x2d7   :  { %v2105_v32 = vrot.slane %v2011_v63, %v3370_v31 }
 0x2d8   :  { %v1714_v13 = vsel %vm929_vm15, %v1713_v21, %v1709_v14 }
 0x2d9   :  { %1716 = vst [vmem:[%s3492_s5 + $0x2] sm:$0x1] %v1714_v13  ;;  %v2106_v57 = vsel %vm929_vm15, %v2105_v32, %v2101_v33 }
 0x2da   :  { %2108 = vst [vmem:[%s3492_s5 + $0x3] sm:$0x1] %v2106_v57 }

</bundles_post_ra>
